<compile_context>
chip_gen: v7x
topology: tpu7x:2x2x1
jax: 0.10.0
libtpu: 0.0.40
codegen_flags: <defaults>
</compile_context>

<pallas_src>
import jax
import jax.numpy as jnp
from jax.experimental import pallas as pl
from jax.experimental.pallas import tpu as pltpu

LEAK = 0.2     # LeakyReLU negative slope
EPS = 1e-5     # PyTorch LayerNorm default eps
LANE = 128


def _round_up(x, m):
    return ((x + m - 1) // m) * m


def make_generator_kernel(real_d, d_pad, dout_pad):
    """Kernel factory: closes over the true feature count (for LayerNorm stats) and
    the padded widths (for static lane slices into the packed vector array)."""
    inv_d = 1.0 / float(real_d)

    def kernel(x_ref, w0_ref, w1_ref, w2_ref, w3_ref, w4_ref, vecs_ref, out_ref):

        def block(x_f32, w_ref, row):
            # Packed per-block vectors: row+0 = bias, row+1 = gamma, row+2 = beta.
            b = vecs_ref[row + 0:row + 1, :d_pad]
            g = vecs_ref[row + 1:row + 2, :d_pad]
            beta = vecs_ref[row + 2:row + 3, :d_pad]
            # Linear: bf16 operands on the MXU, f32 accumulation.
            h = jnp.dot(x_f32.astype(jnp.bfloat16), w_ref[...],
                        preferred_element_type=jnp.float32)
            h = h + b
            # LayerNorm over the true feature count.  Padded lanes of h are exactly 0
            # (zero-padded x / weight cols / bias), so the sums over the padded width
            # equal the sums over the real features.
            s1 = jnp.sum(h, axis=-1, keepdims=True)
            s2 = jnp.sum(h * h, axis=-1, keepdims=True)
            mean = s1 * inv_d
            var = jnp.maximum(s2 * inv_d - mean * mean, 0.0)   # clamp: cancellation
            hn = (h - mean) * jax.lax.rsqrt(var + EPS)
            hn = hn * g + beta                                 # gamma/beta 0 on pad lanes
            return jnp.maximum(hn, LEAK * hn)                  # LeakyReLU(0.2)

        # bf16 stream -> f32 residual carry for all elementwise / LN math.
        x = x_ref[...].astype(jnp.float32)
        x = block(x, w0_ref, 0) + x    # block_0 + residual
        x = block(x, w1_ref, 3) + x    # block_1 + residual
        x = block(x, w2_ref, 6) + x    # block_2 + residual
        x = block(x, w3_ref, 9) + x    # block_3 + residual

        # block_4 (plain Linear) followed by the final LeakyReLU(0.2)
        y = jnp.dot(x.astype(jnp.bfloat16), w4_ref[...],
                    preferred_element_type=jnp.float32)
        y = y + vecs_ref[12:13, :dout_pad]
        out_ref[...] = jnp.maximum(y, LEAK * y).astype(out_ref.dtype)

    return kernel


def init_params(key, input_dim, hidden_dim, layers):
    """PyTorch-default-like init: Linear U(-1/sqrt(fan_in), +); LayerNorm gamma=1, beta=0."""
    params = {}
    out_dim = hidden_dim * (layers + 1)

    def linear(key, fan_in, fan_out):
        kw, kb = jax.random.split(key)
        bound = 1.0 / jnp.sqrt(fan_in)
        w = jax.random.uniform(kw, (fan_in, fan_out), jnp.float32, -bound, bound)
        b = jax.random.uniform(kb, (fan_out,), jnp.float32, -bound, bound)
        return w, b

    keys = jax.random.split(key, 5)
    for i in range(4):  # block_0 .. block_3
        w, b = linear(keys[i], input_dim, input_dim)
        params[f"w{i}"] = w
        params[f"b{i}"] = b
        params[f"g{i}"] = jnp.ones((input_dim,), jnp.float32)
        params[f"beta{i}"] = jnp.zeros((input_dim,), jnp.float32)
    w4, b4 = linear(keys[4], input_dim, out_dim)
    params["w4"] = w4
    params["b4"] = b4
    return params


def prepare_params(params):
    """One-time (hoisted out of the forward path) padding / packing / bf16 cast.

    Returns device-ready operands:
      * 5 bf16 weight matrices, feature dims zero-padded to multiples of 128 lanes.
      * one packed f32 (16, F_pad) array holding all 13 bias/gamma/beta vectors
        (rows 3i..3i+2 = b_i, gamma_i, beta_i for blocks 0..3; row 12 = b4).
    """
    D = params["w0"].shape[0]
    Dout = params["w4"].shape[1]
    D_pad = _round_up(D, LANE)
    Dout_pad = _round_up(Dout, LANE)
    F_pad = max(D_pad, Dout_pad)

    weights = []
    for i in range(4):
        w = jnp.zeros((D_pad, D_pad), jnp.float32).at[:D, :D].set(params[f"w{i}"])
        weights.append(w.astype(jnp.bfloat16))
    w4 = jnp.zeros((D_pad, Dout_pad), jnp.float32).at[:D, :Dout].set(params["w4"])
    weights.append(w4.astype(jnp.bfloat16))

    vecs = jnp.zeros((16, F_pad), jnp.float32)
    for i in range(4):
        vecs = vecs.at[3 * i + 0, :D].set(params[f"b{i}"])
        vecs = vecs.at[3 * i + 1, :D].set(params[f"g{i}"])
        vecs = vecs.at[3 * i + 2, :D].set(params[f"beta{i}"])
    vecs = vecs.at[12, :Dout].set(params["b4"])

    return {
        "weights": tuple(weights),
        "vecs": vecs,
        "D": D, "Dout": Dout,
        "D_pad": D_pad, "Dout_pad": Dout_pad, "F_pad": F_pad,
    }


def generator_forward(x, prepared, tile_b=None):
    D, Dout = prepared["D"], prepared["Dout"]
    D_pad, Dout_pad, F_pad = prepared["D_pad"], prepared["Dout_pad"], prepared["F_pad"]
    weights, vecs = prepared["weights"], prepared["vecs"]

    B = x.shape[0]
    assert x.shape[1] == D

    # Batch tile: aim for >=2 grid steps (so "parallel" actually shards across both
    # TensorCores on megacore parts), but never below 8 sublane rows and never above
    # 1024 rows (amortizes the ~0.35us/step pipeline overhead on v5e/v6e).
    if tile_b is None:
        tile_b = min(1024, max(8, pl.cdiv(B, 2)))
    TILE_B = _round_up(max(8, min(int(tile_b), B)), 8)
    B_pad = _round_up(B, TILE_B)
    grid = (B_pad // TILE_B,)

    # Activations streamed as bf16 (halves activation HBM traffic and VMEM).
    # Only pad when the shape actually requires it.
    x_bf16 = x.astype(jnp.bfloat16)
    if B_pad != B or D_pad != D:
        x_in = jnp.zeros((B_pad, D_pad), jnp.bfloat16).at[:B, :D].set(x_bf16)
    else:
        x_in = x_bf16

    # Generation-aware VMEM capacity (v7x: 64 MiB/TC, v5e/v6e: 128 MiB).
    try:
        vmem_cap = int(pltpu.get_tpu_info().vmem_capacity_bytes)
    except Exception:
        vmem_cap = 64 << 20  # conservative fallback

    weight_bytes = sum(int(w.nbytes) for w in weights) + int(vecs.nbytes)
    flops = 2 * B_pad * D_pad * (4 * D_pad + Dout_pad)
    transcendentals = 4 * B_pad  # one rsqrt per row per LayerNorm
    bytes_accessed = int(x_in.nbytes) + weight_bytes + B_pad * Dout_pad * 4

    def _call(single_buffer_weights):
        if single_buffer_weights:
            # Constant-index operands never change across grid steps -> 1 buffer.
            def const_spec(shape):
                return pl.BlockSpec(shape, lambda g: (0, 0),
                                    pipeline_mode=pl.Buffered(1))
            wbufs = 1
        else:
            def const_spec(shape):
                return pl.BlockSpec(shape, lambda g: (0, 0))
            wbufs = 2

        in_specs = [pl.BlockSpec((TILE_B, D_pad), lambda g: (g, 0))]        # x tile
        in_specs += [const_spec((D_pad, D_pad)) for _ in range(4)]          # w0..w3
        in_specs += [const_spec((D_pad, Dout_pad))]                         # w4
        in_specs += [const_spec((16, F_pad))]                               # packed vecs
        out_spec = pl.BlockSpec((TILE_B, Dout_pad), lambda g: (g, 0))

        # VMEM budget: resident weights (x buffer count) + double-buffered bf16 input /
        # f32 output activation tiles + ~8 live f32 (TILE_B, D_pad) temporaries + margin.
        act_bytes = 2 * TILE_B * D_pad * 2 + 2 * TILE_B * Dout_pad * 4
        scratch_bytes = 8 * TILE_B * D_pad * 4
        needed = wbufs * weight_bytes + act_bytes + scratch_bytes + (4 << 20)
        vmem_limit = int(min(max(needed, 32 << 20), int(0.9 * vmem_cap)))

        return pl.pallas_call(
            make_generator_kernel(D, D_pad, Dout_pad),
            out_shape=jax.ShapeDtypeStruct((B_pad, Dout_pad), jnp.float32),
            grid_spec=pltpu.PrefetchScalarGridSpec(
                num_scalar_prefetch=0,
                grid=grid,
                in_specs=in_specs,
                out_specs=out_spec),
            compiler_params=pltpu.CompilerParams(
                dimension_semantics=("parallel",),
                vmem_limit_bytes=vmem_limit),
            cost_estimate=pl.CostEstimate(flops=flops,
                                          transcendentals=transcendentals,
                                          bytes_accessed=bytes_accessed),
        )(x_in, *weights, vecs)

    try:
        out_pad = _call(single_buffer_weights=True)
    except Exception:
        # Fallback if this JAX version rejects single-buffered constant operands.
        out_pad = _call(single_buffer_weights=False)

    if B_pad == B and Dout_pad == Dout:
        return out_pad
    return out_pad[:B, :Dout]


def generator_reference(x, params, bf16_matmul=False, bf16_input=False):
    """Pure-JAX reference.  bf16_matmul / bf16_input mirror the kernel's numerics."""
    if bf16_input:
        x = x.astype(jnp.bfloat16).astype(jnp.float32)

    def mm(a, w):
        if bf16_matmul:
            return jnp.dot(a.astype(jnp.bfloat16), w.astype(jnp.bfloat16),
                           preferred_element_type=jnp.float32)
        return jnp.dot(a, w, preferred_element_type=jnp.float32)

    def block(x, i):
        h = mm(x, params[f"w{i}"]) + params[f"b{i}"]
        mean = jnp.mean(h, axis=-1, keepdims=True)
        var = jnp.mean(jnp.square(h - mean), axis=-1, keepdims=True)
        hn = (h - mean) * jax.lax.rsqrt(var + EPS)
        hn = hn * params[f"g{i}"] + params[f"beta{i}"]
        return jnp.where(hn > 0, hn, LEAK * hn)

    for i in range(4):
        x = block(x, i) + x
    y = mm(x, params["w4"]) + params["b4"]
    return jnp.where(y > 0, y, LEAK * y)


if __name__ == "__main__":
    input_dim, hidden_dim, layers = 32, 16, 3   # out_dim = 16 * (3 + 1) = 64
    batch = 32

    key = jax.random.PRNGKey(0)
    kx, kp = jax.random.split(key)
    x = jax.random.normal(kx, (batch, input_dim), jnp.float32)
    params = init_params(kp, input_dim, hidden_dim, layers)

    # One-time weight preparation (hoisted out of the forward path).
    prepared = prepare_params(params)

    # Default tiling: TILE_B = 16 -> grid = (2,) so both cores are exercised.
    out = generator_forward(x, prepared)
    out = jax.block_until_ready(out)
    assert out.shape == (batch, hidden_dim * (layers + 1))

    # Smaller tile -> grid = (4,); must match the default-tile result.
    out_small = jax.block_until_ready(generator_forward(x, prepared, tile_b=8))
    assert jnp.allclose(out, out_small, atol=1e-5, rtol=1e-5), \
        "Pallas kernel tiling mismatch"

    # Tight check vs a reference matched to the kernel numerics (bf16 input stream,
    # bf16 matmul operands, f32 everything else).
    ref_bf16 = generator_reference(x, params, bf16_matmul=True, bf16_input=True)
    assert jnp.allclose(out, ref_bf16, atol=3e-3, rtol=3e-3), \
        "Pallas kernel mismatch vs bf16-matched reference"

    # Loose check vs the full-f32 (PyTorch-faithful) reference (bf16 error bound).
    ref_f32 = generator_reference(x, params)
    assert jnp.allclose(out, ref_f32, atol=5e-2, rtol=5e-2), \
        "Pallas kernel mismatch vs f32 reference"

    print("KERNEL_OK")
</pallas_src>

<mosaic_0001>
module attributes {stable_mosaic.version = 11 : i64} {
  func.func @kernel(%arg0: i32, %arg1: memref<16x128xbf16, #tpu.memory_space<vmem>>, %arg2: memref<128x128xbf16, #tpu.memory_space<vmem>>, %arg3: memref<128x128xbf16, #tpu.memory_space<vmem>>, %arg4: memref<128x128xbf16, #tpu.memory_space<vmem>>, %arg5: memref<128x128xbf16, #tpu.memory_space<vmem>>, %arg6: memref<128x128xbf16, #tpu.memory_space<vmem>>, %arg7: memref<16x128xf32, #tpu.memory_space<vmem>>, %arg8: memref<16x128xf32, #tpu.memory_space<vmem>>) attributes {dimension_semantics = [#tpu.dimension_semantics<parallel>], iteration_bounds = array<i64: 2>, scalar_prefetch = 0 : i64, scratch_operands = 0 : i64, tpu.core_type = #tpu.core_type<tc>, window_params = [{transform_indices = @transform_0, window_bounds = array<i64: 16, 128>}, {pipeline_mode = #tpu.pipeline_mode<synchronous>, transform_indices = @transform_1, window_bounds = array<i64: 128, 128>}, {pipeline_mode = #tpu.pipeline_mode<synchronous>, transform_indices = @transform_2, window_bounds = array<i64: 128, 128>}, {pipeline_mode = #tpu.pipeline_mode<synchronous>, transform_indices = @transform_3, window_bounds = array<i64: 128, 128>}, {pipeline_mode = #tpu.pipeline_mode<synchronous>, transform_indices = @transform_4, window_bounds = array<i64: 128, 128>}, {pipeline_mode = #tpu.pipeline_mode<synchronous>, transform_indices = @transform_5, window_bounds = array<i64: 128, 128>}, {pipeline_mode = #tpu.pipeline_mode<synchronous>, transform_indices = @transform_6, window_bounds = array<i64: 16, 128>}, {transform_indices = @transform_7, window_bounds = array<i64: 16, 128>}]} {
    %c0 = arith.constant 0 : index
    %c0_0 = arith.constant 0 : index
    %0 = vector.load %arg1[%c0, %c0_0] : memref<16x128xbf16, #tpu.memory_space<vmem>>, vector<16x128xbf16>
    %1 = arith.extf %0 : vector<16x128xbf16> to vector<16x128xf32>
    %c0_1 = arith.constant 0 : index
    %c0_2 = arith.constant 0 : index
    %2 = vector.load %arg7[%c0_1, %c0_2] : memref<16x128xf32, #tpu.memory_space<vmem>>, vector<1x128xf32>
    %c1 = arith.constant 1 : index
    %c0_3 = arith.constant 0 : index
    %3 = vector.load %arg7[%c1, %c0_3] : memref<16x128xf32, #tpu.memory_space<vmem>>, vector<1x128xf32>
    %c2 = arith.constant 2 : index
    %c0_4 = arith.constant 0 : index
    %4 = vector.load %arg7[%c2, %c0_4] : memref<16x128xf32, #tpu.memory_space<vmem>>, vector<1x128xf32>
    %5 = arith.truncf %1 : vector<16x128xf32> to vector<16x128xbf16>
    %c0_5 = arith.constant 0 : index
    %c0_6 = arith.constant 0 : index
    %6 = vector.load %arg2[%c0_5, %c0_6] : memref<128x128xbf16, #tpu.memory_space<vmem>>, vector<128x128xbf16>
    %cst = arith.constant dense<0.000000e+00> : vector<16x128xf32>
    %7 = tpu.matmul %5, %6, %cst {dimension_numbers = #tpu.dot_dimension_numbers<[1], [0], [0], [1], [0, 0, 1, 1], [], []>} : vector<16x128xbf16>, vector<128x128xbf16>, vector<16x128xf32> -> vector<16x128xf32>
    %8 = vector.broadcast %2 : vector<1x128xf32> to vector<16x128xf32>
    %9 = arith.addf %7, %8 : vector<16x128xf32>
    %cst_7 = arith.constant dense<0.000000e+00> : vector<16xf32>
    %10 = vector.multi_reduction <add>, %9, %cst_7 [1] : vector<16x128xf32> to vector<16xf32>
    %11 = vector.shape_cast %10 : vector<16xf32> to vector<16x1xf32>
    %12 = arith.mulf %9, %9 : vector<16x128xf32>
    %cst_8 = arith.constant dense<0.000000e+00> : vector<16xf32>
    %13 = vector.multi_reduction <add>, %12, %cst_8 [1] : vector<16x128xf32> to vector<16xf32>
    %14 = vector.shape_cast %13 : vector<16xf32> to vector<16x1xf32>
    %cst_9 = arith.constant 3.125000e-02 : f32
    %15 = vector.broadcast %cst_9 : f32 to vector<16x1xf32>
    %16 = arith.mulf %11, %15 : vector<16x1xf32>
    %cst_10 = arith.constant 3.125000e-02 : f32
    %17 = vector.broadcast %cst_10 : f32 to vector<16x1xf32>
    %18 = arith.mulf %14, %17 : vector<16x1xf32>
    %19 = arith.mulf %16, %16 : vector<16x1xf32>
    %20 = arith.subf %18, %19 : vector<16x1xf32>
    %cst_11 = arith.constant 0.000000e+00 : f32
    %21 = vector.broadcast %cst_11 : f32 to vector<16x1xf32>
    %22 = arith.maximumf %20, %21 : vector<16x1xf32>
    %23 = vector.broadcast %16 : vector<16x1xf32> to vector<16x128xf32>
    %24 = arith.subf %9, %23 : vector<16x128xf32>
    %cst_12 = arith.constant 9.99999974E-6 : f32
    %25 = vector.broadcast %cst_12 : f32 to vector<16x1xf32>
    %26 = arith.addf %22, %25 : vector<16x1xf32>
    %27 = math.rsqrt %26 : vector<16x1xf32>
    %28 = vector.broadcast %27 : vector<16x1xf32> to vector<16x128xf32>
    %29 = arith.mulf %24, %28 : vector<16x128xf32>
    %30 = vector.broadcast %3 : vector<1x128xf32> to vector<16x128xf32>
    %31 = arith.mulf %29, %30 : vector<16x128xf32>
    %32 = vector.broadcast %4 : vector<1x128xf32> to vector<16x128xf32>
    %33 = arith.addf %31, %32 : vector<16x128xf32>
    %cst_13 = arith.constant 2.000000e-01 : f32
    %34 = vector.broadcast %cst_13 : f32 to vector<16x128xf32>
    %35 = arith.mulf %34, %33 : vector<16x128xf32>
    %36 = arith.maximumf %33, %35 : vector<16x128xf32>
    %37 = arith.addf %36, %1 : vector<16x128xf32>
    %c3 = arith.constant 3 : index
    %c0_14 = arith.constant 0 : index
    %38 = vector.load %arg7[%c3, %c0_14] : memref<16x128xf32, #tpu.memory_space<vmem>>, vector<1x128xf32>
    %c4 = arith.constant 4 : index
    %c0_15 = arith.constant 0 : index
    %39 = vector.load %arg7[%c4, %c0_15] : memref<16x128xf32, #tpu.memory_space<vmem>>, vector<1x128xf32>
    %c5 = arith.constant 5 : index
    %c0_16 = arith.constant 0 : index
    %40 = vector.load %arg7[%c5, %c0_16] : memref<16x128xf32, #tpu.memory_space<vmem>>, vector<1x128xf32>
    %41 = arith.truncf %37 : vector<16x128xf32> to vector<16x128xbf16>
    %c0_17 = arith.constant 0 : index
    %c0_18 = arith.constant 0 : index
    %42 = vector.load %arg3[%c0_17, %c0_18] : memref<128x128xbf16, #tpu.memory_space<vmem>>, vector<128x128xbf16>
    %cst_19 = arith.constant dense<0.000000e+00> : vector<16x128xf32>
    %43 = tpu.matmul %41, %42, %cst_19 {dimension_numbers = #tpu.dot_dimension_numbers<[1], [0], [0], [1], [0, 0, 1, 1], [], []>} : vector<16x128xbf16>, vector<128x128xbf16>, vector<16x128xf32> -> vector<16x128xf32>
    %44 = vector.broadcast %38 : vector<1x128xf32> to vector<16x128xf32>
    %45 = arith.addf %43, %44 : vector<16x128xf32>
    %cst_20 = arith.constant dense<0.000000e+00> : vector<16xf32>
    %46 = vector.multi_reduction <add>, %45, %cst_20 [1] : vector<16x128xf32> to vector<16xf32>
    %47 = vector.shape_cast %46 : vector<16xf32> to vector<16x1xf32>
    %48 = arith.mulf %45, %45 : vector<16x128xf32>
    %cst_21 = arith.constant dense<0.000000e+00> : vector<16xf32>
    %49 = vector.multi_reduction <add>, %48, %cst_21 [1] : vector<16x128xf32> to vector<16xf32>
    %50 = vector.shape_cast %49 : vector<16xf32> to vector<16x1xf32>
    %cst_22 = arith.constant 3.125000e-02 : f32
    %51 = vector.broadcast %cst_22 : f32 to vector<16x1xf32>
    %52 = arith.mulf %47, %51 : vector<16x1xf32>
    %cst_23 = arith.constant 3.125000e-02 : f32
    %53 = vector.broadcast %cst_23 : f32 to vector<16x1xf32>
    %54 = arith.mulf %50, %53 : vector<16x1xf32>
    %55 = arith.mulf %52, %52 : vector<16x1xf32>
    %56 = arith.subf %54, %55 : vector<16x1xf32>
    %cst_24 = arith.constant 0.000000e+00 : f32
    %57 = vector.broadcast %cst_24 : f32 to vector<16x1xf32>
    %58 = arith.maximumf %56, %57 : vector<16x1xf32>
    %59 = vector.broadcast %52 : vector<16x1xf32> to vector<16x128xf32>
    %60 = arith.subf %45, %59 : vector<16x128xf32>
    %cst_25 = arith.constant 9.99999974E-6 : f32
    %61 = vector.broadcast %cst_25 : f32 to vector<16x1xf32>
    %62 = arith.addf %58, %61 : vector<16x1xf32>
    %63 = math.rsqrt %62 : vector<16x1xf32>
    %64 = vector.broadcast %63 : vector<16x1xf32> to vector<16x128xf32>
    %65 = arith.mulf %60, %64 : vector<16x128xf32>
    %66 = vector.broadcast %39 : vector<1x128xf32> to vector<16x128xf32>
    %67 = arith.mulf %65, %66 : vector<16x128xf32>
    %68 = vector.broadcast %40 : vector<1x128xf32> to vector<16x128xf32>
    %69 = arith.addf %67, %68 : vector<16x128xf32>
    %cst_26 = arith.constant 2.000000e-01 : f32
    %70 = vector.broadcast %cst_26 : f32 to vector<16x128xf32>
    %71 = arith.mulf %70, %69 : vector<16x128xf32>
    %72 = arith.maximumf %69, %71 : vector<16x128xf32>
    %73 = arith.addf %72, %37 : vector<16x128xf32>
    %c6 = arith.constant 6 : index
    %c0_27 = arith.constant 0 : index
    %74 = vector.load %arg7[%c6, %c0_27] : memref<16x128xf32, #tpu.memory_space<vmem>>, vector<1x128xf32>
    %c7 = arith.constant 7 : index
    %c0_28 = arith.constant 0 : index
    %75 = vector.load %arg7[%c7, %c0_28] : memref<16x128xf32, #tpu.memory_space<vmem>>, vector<1x128xf32>
    %c8 = arith.constant 8 : index
    %c0_29 = arith.constant 0 : index
    %76 = vector.load %arg7[%c8, %c0_29] : memref<16x128xf32, #tpu.memory_space<vmem>>, vector<1x128xf32>
    %77 = arith.truncf %73 : vector<16x128xf32> to vector<16x128xbf16>
    %c0_30 = arith.constant 0 : index
    %c0_31 = arith.constant 0 : index
    %78 = vector.load %arg4[%c0_30, %c0_31] : memref<128x128xbf16, #tpu.memory_space<vmem>>, vector<128x128xbf16>
    %cst_32 = arith.constant dense<0.000000e+00> : vector<16x128xf32>
    %79 = tpu.matmul %77, %78, %cst_32 {dimension_numbers = #tpu.dot_dimension_numbers<[1], [0], [0], [1], [0, 0, 1, 1], [], []>} : vector<16x128xbf16>, vector<128x128xbf16>, vector<16x128xf32> -> vector<16x128xf32>
    %80 = vector.broadcast %74 : vector<1x128xf32> to vector<16x128xf32>
    %81 = arith.addf %79, %80 : vector<16x128xf32>
    %cst_33 = arith.constant dense<0.000000e+00> : vector<16xf32>
    %82 = vector.multi_reduction <add>, %81, %cst_33 [1] : vector<16x128xf32> to vector<16xf32>
    %83 = vector.shape_cast %82 : vector<16xf32> to vector<16x1xf32>
    %84 = arith.mulf %81, %81 : vector<16x128xf32>
    %cst_34 = arith.constant dense<0.000000e+00> : vector<16xf32>
    %85 = vector.multi_reduction <add>, %84, %cst_34 [1] : vector<16x128xf32> to vector<16xf32>
    %86 = vector.shape_cast %85 : vector<16xf32> to vector<16x1xf32>
    %cst_35 = arith.constant 3.125000e-02 : f32
    %87 = vector.broadcast %cst_35 : f32 to vector<16x1xf32>
    %88 = arith.mulf %83, %87 : vector<16x1xf32>
    %cst_36 = arith.constant 3.125000e-02 : f32
    %89 = vector.broadcast %cst_36 : f32 to vector<16x1xf32>
    %90 = arith.mulf %86, %89 : vector<16x1xf32>
    %91 = arith.mulf %88, %88 : vector<16x1xf32>
    %92 = arith.subf %90, %91 : vector<16x1xf32>
    %cst_37 = arith.constant 0.000000e+00 : f32
    %93 = vector.broadcast %cst_37 : f32 to vector<16x1xf32>
    %94 = arith.maximumf %92, %93 : vector<16x1xf32>
    %95 = vector.broadcast %88 : vector<16x1xf32> to vector<16x128xf32>
    %96 = arith.subf %81, %95 : vector<16x128xf32>
    %cst_38 = arith.constant 9.99999974E-6 : f32
    %97 = vector.broadcast %cst_38 : f32 to vector<16x1xf32>
    %98 = arith.addf %94, %97 : vector<16x1xf32>
    %99 = math.rsqrt %98 : vector<16x1xf32>
    %100 = vector.broadcast %99 : vector<16x1xf32> to vector<16x128xf32>
    %101 = arith.mulf %96, %100 : vector<16x128xf32>
    %102 = vector.broadcast %75 : vector<1x128xf32> to vector<16x128xf32>
    %103 = arith.mulf %101, %102 : vector<16x128xf32>
    %104 = vector.broadcast %76 : vector<1x128xf32> to vector<16x128xf32>
    %105 = arith.addf %103, %104 : vector<16x128xf32>
    %cst_39 = arith.constant 2.000000e-01 : f32
    %106 = vector.broadcast %cst_39 : f32 to vector<16x128xf32>
    %107 = arith.mulf %106, %105 : vector<16x128xf32>
    %108 = arith.maximumf %105, %107 : vector<16x128xf32>
    %109 = arith.addf %108, %73 : vector<16x128xf32>
    %c9 = arith.constant 9 : index
    %c0_40 = arith.constant 0 : index
    %110 = vector.load %arg7[%c9, %c0_40] : memref<16x128xf32, #tpu.memory_space<vmem>>, vector<1x128xf32>
    %c10 = arith.constant 10 : index
    %c0_41 = arith.constant 0 : index
    %111 = vector.load %arg7[%c10, %c0_41] : memref<16x128xf32, #tpu.memory_space<vmem>>, vector<1x128xf32>
    %c11 = arith.constant 11 : index
    %c0_42 = arith.constant 0 : index
    %112 = vector.load %arg7[%c11, %c0_42] : memref<16x128xf32, #tpu.memory_space<vmem>>, vector<1x128xf32>
    %113 = arith.truncf %109 : vector<16x128xf32> to vector<16x128xbf16>
    %c0_43 = arith.constant 0 : index
    %c0_44 = arith.constant 0 : index
    %114 = vector.load %arg5[%c0_43, %c0_44] : memref<128x128xbf16, #tpu.memory_space<vmem>>, vector<128x128xbf16>
    %cst_45 = arith.constant dense<0.000000e+00> : vector<16x128xf32>
    %115 = tpu.matmul %113, %114, %cst_45 {dimension_numbers = #tpu.dot_dimension_numbers<[1], [0], [0], [1], [0, 0, 1, 1], [], []>} : vector<16x128xbf16>, vector<128x128xbf16>, vector<16x128xf32> -> vector<16x128xf32>
    %116 = vector.broadcast %110 : vector<1x128xf32> to vector<16x128xf32>
    %117 = arith.addf %115, %116 : vector<16x128xf32>
    %cst_46 = arith.constant dense<0.000000e+00> : vector<16xf32>
    %118 = vector.multi_reduction <add>, %117, %cst_46 [1] : vector<16x128xf32> to vector<16xf32>
    %119 = vector.shape_cast %118 : vector<16xf32> to vector<16x1xf32>
    %120 = arith.mulf %117, %117 : vector<16x128xf32>
    %cst_47 = arith.constant dense<0.000000e+00> : vector<16xf32>
    %121 = vector.multi_reduction <add>, %120, %cst_47 [1] : vector<16x128xf32> to vector<16xf32>
    %122 = vector.shape_cast %121 : vector<16xf32> to vector<16x1xf32>
    %cst_48 = arith.constant 3.125000e-02 : f32
    %123 = vector.broadcast %cst_48 : f32 to vector<16x1xf32>
    %124 = arith.mulf %119, %123 : vector<16x1xf32>
    %cst_49 = arith.constant 3.125000e-02 : f32
    %125 = vector.broadcast %cst_49 : f32 to vector<16x1xf32>
    %126 = arith.mulf %122, %125 : vector<16x1xf32>
    %127 = arith.mulf %124, %124 : vector<16x1xf32>
    %128 = arith.subf %126, %127 : vector<16x1xf32>
    %cst_50 = arith.constant 0.000000e+00 : f32
    %129 = vector.broadcast %cst_50 : f32 to vector<16x1xf32>
    %130 = arith.maximumf %128, %129 : vector<16x1xf32>
    %131 = vector.broadcast %124 : vector<16x1xf32> to vector<16x128xf32>
    %132 = arith.subf %117, %131 : vector<16x128xf32>
    %cst_51 = arith.constant 9.99999974E-6 : f32
    %133 = vector.broadcast %cst_51 : f32 to vector<16x1xf32>
    %134 = arith.addf %130, %133 : vector<16x1xf32>
    %135 = math.rsqrt %134 : vector<16x1xf32>
    %136 = vector.broadcast %135 : vector<16x1xf32> to vector<16x128xf32>
    %137 = arith.mulf %132, %136 : vector<16x128xf32>
    %138 = vector.broadcast %111 : vector<1x128xf32> to vector<16x128xf32>
    %139 = arith.mulf %137, %138 : vector<16x128xf32>
    %140 = vector.broadcast %112 : vector<1x128xf32> to vector<16x128xf32>
    %141 = arith.addf %139, %140 : vector<16x128xf32>
    %cst_52 = arith.constant 2.000000e-01 : f32
    %142 = vector.broadcast %cst_52 : f32 to vector<16x128xf32>
    %143 = arith.mulf %142, %141 : vector<16x128xf32>
    %144 = arith.maximumf %141, %143 : vector<16x128xf32>
    %145 = arith.addf %144, %109 : vector<16x128xf32>
    %146 = arith.truncf %145 : vector<16x128xf32> to vector<16x128xbf16>
    %c0_53 = arith.constant 0 : index
    %c0_54 = arith.constant 0 : index
    %147 = vector.load %arg6[%c0_53, %c0_54] : memref<128x128xbf16, #tpu.memory_space<vmem>>, vector<128x128xbf16>
    %cst_55 = arith.constant dense<0.000000e+00> : vector<16x128xf32>
    %148 = tpu.matmul %146, %147, %cst_55 {dimension_numbers = #tpu.dot_dimension_numbers<[1], [0], [0], [1], [0, 0, 1, 1], [], []>} : vector<16x128xbf16>, vector<128x128xbf16>, vector<16x128xf32> -> vector<16x128xf32>
    %c12 = arith.constant 12 : index
    %c0_56 = arith.constant 0 : index
    %149 = vector.load %arg7[%c12, %c0_56] : memref<16x128xf32, #tpu.memory_space<vmem>>, vector<1x128xf32>
    %150 = vector.broadcast %149 : vector<1x128xf32> to vector<16x128xf32>
    %151 = arith.addf %148, %150 : vector<16x128xf32>
    %cst_57 = arith.constant 2.000000e-01 : f32
    %152 = vector.broadcast %cst_57 : f32 to vector<16x128xf32>
    %153 = arith.mulf %152, %151 : vector<16x128xf32>
    %154 = arith.maximumf %151, %153 : vector<16x128xf32>
    %c0_58 = arith.constant 0 : index
    %c0_59 = arith.constant 0 : index
    %155 = vector.load %arg8[%c0_58, %c0_59] : memref<16x128xf32, #tpu.memory_space<vmem>>, vector<16x128xf32>
    tpu.vector_store %arg8[%c0_58, %c0_59], %154 {strides = array<i32>} : memref<16x128xf32, #tpu.memory_space<vmem>>, vector<16x128xf32>,
    return
  }
  func.func @transform_0(%arg0: i32) -> (i32, i32) {
    %c0_i32 = arith.constant 0 : i32
    %c0_i32_0 = arith.constant 0 : i32
    return %arg0, %c0_i32 : i32, i32
  }
  func.func @transform_1(%arg0: i32) -> (i32, i32) {
    %c0_i32 = arith.constant 0 : i32
    %c0_i32_0 = arith.constant 0 : i32
    %c0_i32_1 = arith.constant 0 : i32
    return %c0_i32, %c0_i32_0 : i32, i32
  }
  func.func @transform_2(%arg0: i32) -> (i32, i32) {
    %c0_i32 = arith.constant 0 : i32
    %c0_i32_0 = arith.constant 0 : i32
    %c0_i32_1 = arith.constant 0 : i32
    return %c0_i32, %c0_i32_0 : i32, i32
  }
  func.func @transform_3(%arg0: i32) -> (i32, i32) {
    %c0_i32 = arith.constant 0 : i32
    %c0_i32_0 = arith.constant 0 : i32
    %c0_i32_1 = arith.constant 0 : i32
    return %c0_i32, %c0_i32_0 : i32, i32
  }
  func.func @transform_4(%arg0: i32) -> (i32, i32) {
    %c0_i32 = arith.constant 0 : i32
    %c0_i32_0 = arith.constant 0 : i32
    %c0_i32_1 = arith.constant 0 : i32
    return %c0_i32, %c0_i32_0 : i32, i32
  }
  func.func @transform_5(%arg0: i32) -> (i32, i32) {
    %c0_i32 = arith.constant 0 : i32
    %c0_i32_0 = arith.constant 0 : i32
    %c0_i32_1 = arith.constant 0 : i32
    return %c0_i32, %c0_i32_0 : i32, i32
  }
  func.func @transform_6(%arg0: i32) -> (i32, i32) {
    %c0_i32 = arith.constant 0 : i32
    %c0_i32_0 = arith.constant 0 : i32
    %c0_i32_1 = arith.constant 0 : i32
    return %c0_i32, %c0_i32_0 : i32, i32
  }
  func.func @transform_7(%arg0: i32) -> (i32, i32) {
    %c0_i32 = arith.constant 0 : i32
    %c0_i32_0 = arith.constant 0 : i32
    return %arg0, %c0_i32 : i32, i32
  }
}

module attributes {stable_mosaic.version = 11 : i64} {
  func.func @kernel(%arg0: i32, %arg1: memref<16x128xbf16, #tpu.memory_space<vmem>>, %arg2: memref<128x128xbf16, #tpu.memory_space<vmem>>, %arg3: memref<128x128xbf16, #tpu.memory_space<vmem>>, %arg4: memref<128x128xbf16, #tpu.memory_space<vmem>>, %arg5: memref<128x128xbf16, #tpu.memory_space<vmem>>, %arg6: memref<128x128xbf16, #tpu.memory_space<vmem>>, %arg7: memref<16x128xf32, #tpu.memory_space<vmem>>, %arg8: memref<16x128xf32, #tpu.memory_space<vmem>>) attributes {dimension_semantics = [#tpu.dimension_semantics<parallel>], iteration_bounds = array<i64: 2>, scalar_prefetch = 0 : i64, scratch_operands = 0 : i64, tpu.core_type = #tpu.core_type<tc>, window_params = [{transform_indices = @transform_0, window_bounds = array<i64: 16, 128>}, {pipeline_mode = #tpu.pipeline_mode<synchronous>, transform_indices = @transform_1, window_bounds = array<i64: 128, 128>}, {pipeline_mode = #tpu.pipeline_mode<synchronous>, transform_indices = @transform_2, window_bounds = array<i64: 128, 128>}, {pipeline_mode = #tpu.pipeline_mode<synchronous>, transform_indices = @transform_3, window_bounds = array<i64: 128, 128>}, {pipeline_mode = #tpu.pipeline_mode<synchronous>, transform_indices = @transform_4, window_bounds = array<i64: 128, 128>}, {pipeline_mode = #tpu.pipeline_mode<synchronous>, transform_indices = @transform_5, window_bounds = array<i64: 128, 128>}, {pipeline_mode = #tpu.pipeline_mode<synchronous>, transform_indices = @transform_6, window_bounds = array<i64: 16, 128>}, {transform_indices = @transform_7, window_bounds = array<i64: 16, 128>}]} {
    %c0 = arith.constant 0 : index
    %c0_0 = arith.constant 0 : index
    %0 = vector.load %arg1[%c0, %c0_0] : memref<16x128xbf16, #tpu.memory_space<vmem>>, vector<16x128xbf16>
    %1 = arith.extf %0 : vector<16x128xbf16> to vector<16x128xf32>
    %c0_1 = arith.constant 0 : index
    %c0_2 = arith.constant 0 : index
    %2 = vector.load %arg7[%c0_1, %c0_2] : memref<16x128xf32, #tpu.memory_space<vmem>>, vector<1x128xf32>
    %c1 = arith.constant 1 : index
    %c0_3 = arith.constant 0 : index
    %3 = vector.load %arg7[%c1, %c0_3] : memref<16x128xf32, #tpu.memory_space<vmem>>, vector<1x128xf32>
    %c2 = arith.constant 2 : index
    %c0_4 = arith.constant 0 : index
    %4 = vector.load %arg7[%c2, %c0_4] : memref<16x128xf32, #tpu.memory_space<vmem>>, vector<1x128xf32>
    %5 = arith.truncf %1 : vector<16x128xf32> to vector<16x128xbf16>
    %c0_5 = arith.constant 0 : index
    %c0_6 = arith.constant 0 : index
    %6 = vector.load %arg2[%c0_5, %c0_6] : memref<128x128xbf16, #tpu.memory_space<vmem>>, vector<128x128xbf16>
    %cst = arith.constant dense<0.000000e+00> : vector<16x128xf32>
    %7 = tpu.matmul %5, %6, %cst {dimension_numbers = #tpu.dot_dimension_numbers<[1], [0], [0], [1], [0, 0, 1, 1], [], []>} : vector<16x128xbf16>, vector<128x128xbf16>, vector<16x128xf32> -> vector<16x128xf32>
    %8 = vector.broadcast %2 : vector<1x128xf32> to vector<16x128xf32>
    %9 = arith.addf %7, %8 : vector<16x128xf32>
    %cst_7 = arith.constant dense<0.000000e+00> : vector<16xf32>
    %10 = vector.multi_reduction <add>, %9, %cst_7 [1] : vector<16x128xf32> to vector<16xf32>
    %11 = vector.shape_cast %10 : vector<16xf32> to vector<16x1xf32>
    %12 = arith.mulf %9, %9 : vector<16x128xf32>
    %cst_8 = arith.constant dense<0.000000e+00> : vector<16xf32>
    %13 = vector.multi_reduction <add>, %12, %cst_8 [1] : vector<16x128xf32> to vector<16xf32>
    %14 = vector.shape_cast %13 : vector<16xf32> to vector<16x1xf32>
    %cst_9 = arith.constant 3.125000e-02 : f32
    %15 = vector.broadcast %cst_9 : f32 to vector<16x1xf32>
    %16 = arith.mulf %11, %15 : vector<16x1xf32>
    %cst_10 = arith.constant 3.125000e-02 : f32
    %17 = vector.broadcast %cst_10 : f32 to vector<16x1xf32>
    %18 = arith.mulf %14, %17 : vector<16x1xf32>
    %19 = arith.mulf %16, %16 : vector<16x1xf32>
    %20 = arith.subf %18, %19 : vector<16x1xf32>
    %cst_11 = arith.constant 0.000000e+00 : f32
    %21 = vector.broadcast %cst_11 : f32 to vector<16x1xf32>
    %22 = arith.maximumf %20, %21 : vector<16x1xf32>
    %23 = vector.broadcast %16 : vector<16x1xf32> to vector<16x128xf32>
    %24 = arith.subf %9, %23 : vector<16x128xf32>
    %cst_12 = arith.constant 9.99999974E-6 : f32
    %25 = vector.broadcast %cst_12 : f32 to vector<16x1xf32>
    %26 = arith.addf %22, %25 : vector<16x1xf32>
    %27 = math.rsqrt %26 : vector<16x1xf32>
    %28 = vector.broadcast %27 : vector<16x1xf32> to vector<16x128xf32>
    %29 = arith.mulf %24, %28 : vector<16x128xf32>
    %30 = vector.broadcast %3 : vector<1x128xf32> to vector<16x128xf32>
    %31 = arith.mulf %29, %30 : vector<16x128xf32>
    %32 = vector.broadcast %4 : vector<1x128xf32> to vector<16x128xf32>
    %33 = arith.addf %31, %32 : vector<16x128xf32>
    %cst_13 = arith.constant 2.000000e-01 : f32
    %34 = vector.broadcast %cst_13 : f32 to vector<16x128xf32>
    %35 = arith.mulf %34, %33 : vector<16x128xf32>
    %36 = arith.maximumf %33, %35 : vector<16x128xf32>
    %37 = arith.addf %36, %1 : vector<16x128xf32>
    %c3 = arith.constant 3 : index
    %c0_14 = arith.constant 0 : index
    %38 = vector.load %arg7[%c3, %c0_14] : memref<16x128xf32, #tpu.memory_space<vmem>>, vector<1x128xf32>
    %c4 = arith.constant 4 : index
    %c0_15 = arith.constant 0 : index
    %39 = vector.load %arg7[%c4, %c0_15] : memref<16x128xf32, #tpu.memory_space<vmem>>, vector<1x128xf32>
    %c5 = arith.constant 5 : index
    %c0_16 = arith.constant 0 : index
    %40 = vector.load %arg7[%c5, %c0_16] : memref<16x128xf32, #tpu.memory_space<vmem>>, vector<1x128xf32>
    %41 = arith.truncf %37 : vector<16x128xf32> to vector<16x128xbf16>
    %c0_17 = arith.constant 0 : index
    %c0_18 = arith.constant 0 : index
    %42 = vector.load %arg3[%c0_17, %c0_18] : memref<128x128xbf16, #tpu.memory_space<vmem>>, vector<128x128xbf16>
    %cst_19 = arith.constant dense<0.000000e+00> : vector<16x128xf32>
    %43 = tpu.matmul %41, %42, %cst_19 {dimension_numbers = #tpu.dot_dimension_numbers<[1], [0], [0], [1], [0, 0, 1, 1], [], []>} : vector<16x128xbf16>, vector<128x128xbf16>, vector<16x128xf32> -> vector<16x128xf32>
    %44 = vector.broadcast %38 : vector<1x128xf32> to vector<16x128xf32>
    %45 = arith.addf %43, %44 : vector<16x128xf32>
    %cst_20 = arith.constant dense<0.000000e+00> : vector<16xf32>
    %46 = vector.multi_reduction <add>, %45, %cst_20 [1] : vector<16x128xf32> to vector<16xf32>
    %47 = vector.shape_cast %46 : vector<16xf32> to vector<16x1xf32>
    %48 = arith.mulf %45, %45 : vector<16x128xf32>
    %cst_21 = arith.constant dense<0.000000e+00> : vector<16xf32>
    %49 = vector.multi_reduction <add>, %48, %cst_21 [1] : vector<16x128xf32> to vector<16xf32>
    %50 = vector.shape_cast %49 : vector<16xf32> to vector<16x1xf32>
    %cst_22 = arith.constant 3.125000e-02 : f32
    %51 = vector.broadcast %cst_22 : f32 to vector<16x1xf32>
    %52 = arith.mulf %47, %51 : vector<16x1xf32>
    %cst_23 = arith.constant 3.125000e-02 : f32
    %53 = vector.broadcast %cst_23 : f32 to vector<16x1xf32>
    %54 = arith.mulf %50, %53 : vector<16x1xf32>
    %55 = arith.mulf %52, %52 : vector<16x1xf32>
    %56 = arith.subf %54, %55 : vector<16x1xf32>
    %cst_24 = arith.constant 0.000000e+00 : f32
    %57 = vector.broadcast %cst_24 : f32 to vector<16x1xf32>
    %58 = arith.maximumf %56, %57 : vector<16x1xf32>
    %59 = vector.broadcast %52 : vector<16x1xf32> to vector<16x128xf32>
    %60 = arith.subf %45, %59 : vector<16x128xf32>
    %cst_25 = arith.constant 9.99999974E-6 : f32
    %61 = vector.broadcast %cst_25 : f32 to vector<16x1xf32>
    %62 = arith.addf %58, %61 : vector<16x1xf32>
    %63 = math.rsqrt %62 : vector<16x1xf32>
    %64 = vector.broadcast %63 : vector<16x1xf32> to vector<16x128xf32>
    %65 = arith.mulf %60, %64 : vector<16x128xf32>
    %66 = vector.broadcast %39 : vector<1x128xf32> to vector<16x128xf32>
    %67 = arith.mulf %65, %66 : vector<16x128xf32>
    %68 = vector.broadcast %40 : vector<1x128xf32> to vector<16x128xf32>
    %69 = arith.addf %67, %68 : vector<16x128xf32>
    %cst_26 = arith.constant 2.000000e-01 : f32
    %70 = vector.broadcast %cst_26 : f32 to vector<16x128xf32>
    %71 = arith.mulf %70, %69 : vector<16x128xf32>
    %72 = arith.maximumf %69, %71 : vector<16x128xf32>
    %73 = arith.addf %72, %37 : vector<16x128xf32>
    %c6 = arith.constant 6 : index
    %c0_27 = arith.constant 0 : index
    %74 = vector.load %arg7[%c6, %c0_27] : memref<16x128xf32, #tpu.memory_space<vmem>>, vector<1x128xf32>
    %c7 = arith.constant 7 : index
    %c0_28 = arith.constant 0 : index
    %75 = vector.load %arg7[%c7, %c0_28] : memref<16x128xf32, #tpu.memory_space<vmem>>, vector<1x128xf32>
    %c8 = arith.constant 8 : index
    %c0_29 = arith.constant 0 : index
    %76 = vector.load %arg7[%c8, %c0_29] : memref<16x128xf32, #tpu.memory_space<vmem>>, vector<1x128xf32>
    %77 = arith.truncf %73 : vector<16x128xf32> to vector<16x128xbf16>
    %c0_30 = arith.constant 0 : index
    %c0_31 = arith.constant 0 : index
    %78 = vector.load %arg4[%c0_30, %c0_31] : memref<128x128xbf16, #tpu.memory_space<vmem>>, vector<128x128xbf16>
    %cst_32 = arith.constant dense<0.000000e+00> : vector<16x128xf32>
    %79 = tpu.matmul %77, %78, %cst_32 {dimension_numbers = #tpu.dot_dimension_numbers<[1], [0], [0], [1], [0, 0, 1, 1], [], []>} : vector<16x128xbf16>, vector<128x128xbf16>, vector<16x128xf32> -> vector<16x128xf32>
    %80 = vector.broadcast %74 : vector<1x128xf32> to vector<16x128xf32>
    %81 = arith.addf %79, %80 : vector<16x128xf32>
    %cst_33 = arith.constant dense<0.000000e+00> : vector<16xf32>
    %82 = vector.multi_reduction <add>, %81, %cst_33 [1] : vector<16x128xf32> to vector<16xf32>
    %83 = vector.shape_cast %82 : vector<16xf32> to vector<16x1xf32>
    %84 = arith.mulf %81, %81 : vector<16x128xf32>
    %cst_34 = arith.constant dense<0.000000e+00> : vector<16xf32>
    %85 = vector.multi_reduction <add>, %84, %cst_34 [1] : vector<16x128xf32> to vector<16xf32>
    %86 = vector.shape_cast %85 : vector<16xf32> to vector<16x1xf32>
    %cst_35 = arith.constant 3.125000e-02 : f32
    %87 = vector.broadcast %cst_35 : f32 to vector<16x1xf32>
    %88 = arith.mulf %83, %87 : vector<16x1xf32>
    %cst_36 = arith.constant 3.125000e-02 : f32
    %89 = vector.broadcast %cst_36 : f32 to vector<16x1xf32>
    %90 = arith.mulf %86, %89 : vector<16x1xf32>
    %91 = arith.mulf %88, %88 : vector<16x1xf32>
    %92 = arith.subf %90, %91 : vector<16x1xf32>
    %cst_37 = arith.constant 0.000000e+00 : f32
    %93 = vector.broadcast %cst_37 : f32 to vector<16x1xf32>
    %94 = arith.maximumf %92, %93 : vector<16x1xf32>
    %95 = vector.broadcast %88 : vector<16x1xf32> to vector<16x128xf32>
    %96 = arith.subf %81, %95 : vector<16x128xf32>
    %cst_38 = arith.constant 9.99999974E-6 : f32
    %97 = vector.broadcast %cst_38 : f32 to vector<16x1xf32>
    %98 = arith.addf %94, %97 : vector<16x1xf32>
    %99 = math.rsqrt %98 : vector<16x1xf32>
    %100 = vector.broadcast %99 : vector<16x1xf32> to vector<16x128xf32>
    %101 = arith.mulf %96, %100 : vector<16x128xf32>
    %102 = vector.broadcast %75 : vector<1x128xf32> to vector<16x128xf32>
    %103 = arith.mulf %101, %102 : vector<16x128xf32>
    %104 = vector.broadcast %76 : vector<1x128xf32> to vector<16x128xf32>
    %105 = arith.addf %103, %104 : vector<16x128xf32>
    %cst_39 = arith.constant 2.000000e-01 : f32
    %106 = vector.broadcast %cst_39 : f32 to vector<16x128xf32>
    %107 = arith.mulf %106, %105 : vector<16x128xf32>
    %108 = arith.maximumf %105, %107 : vector<16x128xf32>
    %109 = arith.addf %108, %73 : vector<16x128xf32>
    %c9 = arith.constant 9 : index
    %c0_40 = arith.constant 0 : index
    %110 = vector.load %arg7[%c9, %c0_40] : memref<16x128xf32, #tpu.memory_space<vmem>>, vector<1x128xf32>
    %c10 = arith.constant 10 : index
    %c0_41 = arith.constant 0 : index
    %111 = vector.load %arg7[%c10, %c0_41] : memref<16x128xf32, #tpu.memory_space<vmem>>, vector<1x128xf32>
    %c11 = arith.constant 11 : index
    %c0_42 = arith.constant 0 : index
    %112 = vector.load %arg7[%c11, %c0_42] : memref<16x128xf32, #tpu.memory_space<vmem>>, vector<1x128xf32>
    %113 = arith.truncf %109 : vector<16x128xf32> to vector<16x128xbf16>
    %c0_43 = arith.constant 0 : index
    %c0_44 = arith.constant 0 : index
    %114 = vector.load %arg5[%c0_43, %c0_44] : memref<128x128xbf16, #tpu.memory_space<vmem>>, vector<128x128xbf16>
    %cst_45 = arith.constant dense<0.000000e+00> : vector<16x128xf32>
    %115 = tpu.matmul %113, %114, %cst_45 {dimension_numbers = #tpu.dot_dimension_numbers<[1], [0], [0], [1], [0, 0, 1, 1], [], []>} : vector<16x128xbf16>, vector<128x128xbf16>, vector<16x128xf32> -> vector<16x128xf32>
    %116 = vector.broadcast %110 : vector<1x128xf32> to vector<16x128xf32>
    %117 = arith.addf %115, %116 : vector<16x128xf32>
    %cst_46 = arith.constant dense<0.000000e+00> : vector<16xf32>
    %118 = vector.multi_reduction <add>, %117, %cst_46 [1] : vector<16x128xf32> to vector<16xf32>
    %119 = vector.shape_cast %118 : vector<16xf32> to vector<16x1xf32>
    %120 = arith.mulf %117, %117 : vector<16x128xf32>
    %cst_47 = arith.constant dense<0.000000e+00> : vector<16xf32>
    %121 = vector.multi_reduction <add>, %120, %cst_47 [1] : vector<16x128xf32> to vector<16xf32>
    %122 = vector.shape_cast %121 : vector<16xf32> to vector<16x1xf32>
    %cst_48 = arith.constant 3.125000e-02 : f32
    %123 = vector.broadcast %cst_48 : f32 to vector<16x1xf32>
    %124 = arith.mulf %119, %123 : vector<16x1xf32>
    %cst_49 = arith.constant 3.125000e-02 : f32
    %125 = vector.broadcast %cst_49 : f32 to vector<16x1xf32>
    %126 = arith.mulf %122, %125 : vector<16x1xf32>
    %127 = arith.mulf %124, %124 : vector<16x1xf32>
    %128 = arith.subf %126, %127 : vector<16x1xf32>
    %cst_50 = arith.constant 0.000000e+00 : f32
    %129 = vector.broadcast %cst_50 : f32 to vector<16x1xf32>
    %130 = arith.maximumf %128, %129 : vector<16x1xf32>
    %131 = vector.broadcast %124 : vector<16x1xf32> to vector<16x128xf32>
    %132 = arith.subf %117, %131 : vector<16x128xf32>
    %cst_51 = arith.constant 9.99999974E-6 : f32
    %133 = vector.broadcast %cst_51 : f32 to vector<16x1xf32>
    %134 = arith.addf %130, %133 : vector<16x1xf32>
    %135 = math.rsqrt %134 : vector<16x1xf32>
    %136 = vector.broadcast %135 : vector<16x1xf32> to vector<16x128xf32>
    %137 = arith.mulf %132, %136 : vector<16x128xf32>
    %138 = vector.broadcast %111 : vector<1x128xf32> to vector<16x128xf32>
    %139 = arith.mulf %137, %138 : vector<16x128xf32>
    %140 = vector.broadcast %112 : vector<1x128xf32> to vector<16x128xf32>
    %141 = arith.addf %139, %140 : vector<16x128xf32>
    %cst_52 = arith.constant 2.000000e-01 : f32
    %142 = vector.broadcast %cst_52 : f32 to vector<16x128xf32>
    %143 = arith.mulf %142, %141 : vector<16x128xf32>
    %144 = arith.maximumf %141, %143 : vector<16x128xf32>
    %145 = arith.addf %144, %109 : vector<16x128xf32>
    %146 = arith.truncf %145 : vector<16x128xf32> to vector<16x128xbf16>
    %c0_53 = arith.constant 0 : index
    %c0_54 = arith.constant 0 : index
    %147 = vector.load %arg6[%c0_53, %c0_54] : memref<128x128xbf16, #tpu.memory_space<vmem>>, vector<128x128xbf16>
    %cst_55 = arith.constant dense<0.000000e+00> : vector<16x128xf32>
    %148 = tpu.matmul %146, %147, %cst_55 {dimension_numbers = #tpu.dot_dimension_numbers<[1], [0], [0], [1], [0, 0, 1, 1], [], []>} : vector<16x128xbf16>, vector<128x128xbf16>, vector<16x128xf32> -> vector<16x128xf32>
    %c12 = arith.constant 12 : index
    %c0_56 = arith.constant 0 : index
    %149 = vector.load %arg7[%c12, %c0_56] : memref<16x128xf32, #tpu.memory_space<vmem>>, vector<1x128xf32>
    %150 = vector.broadcast %149 : vector<1x128xf32> to vector<16x128xf32>
    %151 = arith.addf %148, %150 : vector<16x128xf32>
    %cst_57 = arith.constant 2.000000e-01 : f32
    %152 = vector.broadcast %cst_57 : f32 to vector<16x128xf32>
    %153 = arith.mulf %152, %151 : vector<16x128xf32>
    %154 = arith.maximumf %151, %153 : vector<16x128xf32>
    %c0_58 = arith.constant 0 : index
    %c0_59 = arith.constant 0 : index
    %155 = vector.load %arg8[%c0_58, %c0_59] : memref<16x128xf32, #tpu.memory_space<vmem>>, vector<16x128xf32>
    tpu.vector_store %arg8[%c0_58, %c0_59], %154 {strides = array<i32>} : memref<16x128xf32, #tpu.memory_space<vmem>>, vector<16x128xf32>,
    return
  }
  func.func @transform_0(%arg0: i32) -> (i32, i32) {
    %c0_i32 = arith.constant 0 : i32
    %c0_i32_0 = arith.constant 0 : i32
    return %arg0, %c0_i32 : i32, i32
  }
  func.func @transform_1(%arg0: i32) -> (i32, i32) {
    %c0_i32 = arith.constant 0 : i32
    %c0_i32_0 = arith.constant 0 : i32
    %c0_i32_1 = arith.constant 0 : i32
    return %c0_i32, %c0_i32_0 : i32, i32
  }
  func.func @transform_2(%arg0: i32) -> (i32, i32) {
    %c0_i32 = arith.constant 0 : i32
    %c0_i32_0 = arith.constant 0 : i32
    %c0_i32_1 = arith.constant 0 : i32
    return %c0_i32, %c0_i32_0 : i32, i32
  }
  func.func @transform_3(%arg0: i32) -> (i32, i32) {
    %c0_i32 = arith.constant 0 : i32
    %c0_i32_0 = arith.constant 0 : i32
    %c0_i32_1 = arith.constant 0 : i32
    return %c0_i32, %c0_i32_0 : i32, i32
  }
  func.func @transform_4(%arg0: i32) -> (i32, i32) {
    %c0_i32 = arith.constant 0 : i32
    %c0_i32_0 = arith.constant 0 : i32
    %c0_i32_1 = arith.constant 0 : i32
    return %c0_i32, %c0_i32_0 : i32, i32
  }
  func.func @transform_5(%arg0: i32) -> (i32, i32) {
    %c0_i32 = arith.constant 0 : i32
    %c0_i32_0 = arith.constant 0 : i32
    %c0_i32_1 = arith.constant 0 : i32
    return %c0_i32, %c0_i32_0 : i32, i32
  }
  func.func @transform_6(%arg0: i32) -> (i32, i32) {
    %c0_i32 = arith.constant 0 : i32
    %c0_i32_0 = arith.constant 0 : i32
    %c0_i32_1 = arith.constant 0 : i32
    return %c0_i32, %c0_i32_0 : i32, i32
  }
  func.func @transform_7(%arg0: i32) -> (i32, i32) {
    %c0_i32 = arith.constant 0 : i32
    %c0_i32_0 = arith.constant 0 : i32
    return %arg0, %c0_i32 : i32, i32
  }
}

</mosaic_0001>

<bundles_post_ra>
// kernel: tpu_custom_call.1
= control target key start
LH: loop header
LB: loop body
LE: loop exit
PB: predicated region body
PF: predicated region fallthrough
CT: control target
= control target key end

     0   :  { %12 = vsyncpa [#allocation3], 0  ;;  %s2400_s0 = inlined_call_operand.hbm [shape: bf16[32,128], index: 0, kind: input, shape index: {}]   ;;  %s2401_s1 = inlined_call_operand.hbm [shape: bf16[128,128], index: 1, kind: input, shape index: {}]   ;;  %s2402_s2 = inlined_call_operand.hbm [shape: bf16[128,128], index: 2, kind: input, shape index: {}]   ;;  %s2403_s3 = inlined_call_operand.hbm [shape: bf16[128,128], index: 3, kind: input, shape index: {}]   ;;  %s2404_s4 = inlined_call_operand.hbm [shape: bf16[128,128], index: 4, kind: input, shape index: {}]   ;;  %s2405_s5 = inlined_call_operand.hbm [shape: bf16[128,128], index: 5, kind: input, shape index: {}]   ;;  %s2406_s6 = inlined_call_operand.vmem [shape: f32[16,128], index: 6, kind: input, shape index: {}]   ;;  %s2407_s7 = inlined_call_operand.hbm [shape: f32[32,128], index: 7, kind: output, shape index: {}]  }
   0x1   :  { %14 = vsyncpa [#allocation3 + $0x1], 0 }
   0x2   :  { %15 = vsyncpa [#allocation6], 0 }
   0x3   :  { %16 = vsyncpa [#allocation9], 0 }
   0x4   :  { %17 = vsyncpa [#allocation12], 0 }
   0x5   :  { %18 = vsyncpa [#allocation4], 0 }
   0x6   :  { %20 = vsyncpa [#allocation4 + $0x1], 0  ;;  %s1959_s24 = smov 0   ;;  %s1961_s25 = smov 0  }
   0x7   :  { %s1963_s26 = smov 0   ;;  %s1965_s27 = smov 0  }
   0x8 LB: > { %s1906_s28 = smov [#allocation5]   ;;  %s1980_s30 = sadd.s32 4294967295, %s1904_s27   ;;  %s1904_s27 = sphi %s1965_s27, %s2434_s27   ;;  %s1900_s26 = sphi %s1963_s26, %s2433_s26   ;;  %s1896_s25 = sphi %s1961_s25, %s2432_s25   ;;  %s1892_s24 = sphi %s1959_s24, %s2431_s24  }
   0x9   : > { %s221_s29 = sshll.u32 %s1906_s28, 4  ;;  %p1271_p0 = scmp.ge.s32.totalorder %s1904_s27, 1  ;;  %s1985_s29 = int_to_ptr.vmem [resolvable:$true] %s221_s29 }
   0xa   : > { %p2408_p1 = scmp.eq.s32.totalorder %s1980_s30, 0  ;;  %p209_p2 = scmp.lt.s32.totalorder %s1904_s27, 3 }
   0xb   : > { %s1907_s9 = smov [#allocation8]   ;;  %s1908_s12 = smov [#allocation7]  }
   0xc   : > { %p1987_p3 = pnand %p1271_p0, %p209_p2  ;;  %s247_s10 = sshll.u32 %s1907_s9, 4  ;;  %s2000_s10 = int_to_ptr.vmem [resolvable:$true] %s247_s10 }
   0xd   : > { %s234_s13 = sshll.u32 %s1908_s12, 4  ;;  %s1656_s16 = scalar_lea.hbm %s2401_s1, 1024  ;;  %s2002_s13 = int_to_ptr.vmem [resolvable:$true] %s234_s13 }
   0xe   : > { %s2412_s8 = scalar_select %p1987_p3, 1, 0 }
   0xf   : > { %p1519_p5 = pneg %p1987_p3  ;;  %p1657_p7 = scmp.ne.s32.totalorder %s2401_s1, %s1656_s16 }
  0x10   : > { %p1663_p11 = scmp.lt.u32.totalorder %s1656_s16, %s2401_s1 }
  0x11   : > { %p1996_p6 = pnand %p1519_p5, %p2408_p1 }
  0x13   : > { %p2012_p8 = pneg %p1996_p6 }
  0x15   : > { %p1659_p9 = pnand %p2012_p8, %p1657_p7 }
  0x17   : > { %p1660_p10 = pneg %p1659_p9 }
  0x19   : > { %p1665_p12 = pnand %p1663_p11, %p1660_p10 }
  0x1b   : > { %1668 = shalt.err (!%p1665_p12)
}
  0x1c   : > { %s1669_s22 = scalar_lea.vmem %s1985_s29, 1024  ;;  %p1677_p5 = scmp.lt.s32.totalorder %s1985_s29, %s1985_s29 }
  0x1d   : > { %p1670_p13 = scmp.ne.s32.totalorder %s1985_s29, %s1669_s22  ;;  %p1678_p4 = scmp.lt.s32.totalorder %s1669_s22, %s1669_s22 }
  0x1f   : > { %p1672_p0 = pnand %p1670_p13, %p2012_p8  ;;  %p1679_p7 = por %p1678_p4, %p1677_p5 }
  0x21   : > { %p1673_p2 = pneg %p1672_p0 }
  0x23   : > { %p1680_p9 = pnand %p1679_p7, %p1673_p2 }
  0x25   : > { %1683 = shalt.err (!%p1680_p9)
}
  0x26   : > { %s2410_s23 = smov 64   ;;  %s1910_s28 = smov 4  }
  0x27   : > { %1522 = dma.hbm_to_vmem [thread:$0]  (!%p1996_p6), %s2401_s1, 1024, %s1985_s29, [#allocation6], %s2410_s23, %s2410_s23, %s1910_s28  }
  0x28   : > { %s1684_s16 = scalar_lea.hbm %s2403_s3, 1024 }
  0x29   : > { %p1685_p4 = scmp.ne.s32.totalorder %s2403_s3, %s1684_s16  ;;  %p1691_p12 = scmp.lt.u32.totalorder %s1684_s16, %s2403_s3 }
  0x2b   : > { %p1687_p10 = pnand %p1685_p4, %p2012_p8 }
  0x2d   : > { %p1688_p11 = pneg %p1687_p10 }
  0x2f   : > { %p1693_p13 = pnand %p1691_p12, %p1688_p11 }
  0x31   : > { %1696 = shalt.err (!%p1693_p13)
}
  0x32   : > { %s1697_s29 = scalar_lea.vmem %s2000_s10, 1024  ;;  %p1705_p7 = scmp.lt.s32.totalorder %s2000_s10, %s2000_s10 }
  0x33   : > { %p1698_p0 = scmp.ne.s32.totalorder %s2000_s10, %s1697_s29  ;;  %p1706_p9 = scmp.lt.s32.totalorder %s1697_s29, %s1697_s29 }
  0x35   : > { %p1700_p2 = pnand %p1698_p0, %p2012_p8  ;;  %p1707_p4 = por %p1706_p9, %p1705_p7 }
  0x37   : > { %p1701_p5 = pneg %p1700_p2 }
  0x39   : > { %p1708_p10 = pnand %p1707_p4, %p1701_p5 }
  0x3b   : > { %1711 = shalt.err (!%p1708_p10)
}
  0x3c   : > { %1528 = dma.hbm_to_vmem [thread:$0]  (!%p1996_p6), %s2403_s3, 1024, %s2000_s10, [#allocation9], %s2410_s23, %s2410_s23, %s1910_s28  }
  0x3d   : > { %s1712_s15 = scalar_lea.hbm %s2402_s2, 1024 }
  0x3e   : > { %p1713_p11 = scmp.ne.s32.totalorder %s2402_s2, %s1712_s15  ;;  %p1719_p0 = scmp.lt.u32.totalorder %s1712_s15, %s2402_s2 }
  0x40   : > { %p1715_p12 = pnand %p1713_p11, %p2012_p8 }
  0x42   : > { %p1716_p13 = pneg %p1715_p12 }
  0x44   : > { %p1721_p2 = pnand %p1719_p0, %p1716_p13 }
  0x46   : > { %1724 = shalt.err (!%p1721_p2)
}
  0x47   : > { %s1725_s10 = scalar_lea.vmem %s2002_s13, 1024  ;;  %p1733_p4 = scmp.lt.s32.totalorder %s2002_s13, %s2002_s13 }
  0x48   : > { %p1726_p5 = scmp.ne.s32.totalorder %s2002_s13, %s1725_s10  ;;  %p1734_p10 = scmp.lt.s32.totalorder %s1725_s10, %s1725_s10 }
  0x4a   : > { %p1728_p7 = pnand %p1726_p5, %p2012_p8  ;;  %p1735_p11 = por %p1734_p10, %p1733_p4 }
  0x4c   : > { %p1729_p9 = pneg %p1728_p7 }
  0x4e   : > { %p1736_p12 = pnand %p1735_p11, %p1729_p9 }
  0x50   : > { %1739 = shalt.err (!%p1736_p12)
}
  0x51   : > { %1525 = dma.hbm_to_vmem [thread:$0]  (!%p1996_p6), %s2402_s2, 1024, %s2002_s13, [#allocation6], %s2410_s23, %s2410_s23, %s1910_s28  }
  0x52   : > { %s1911_s22 = smov [#allocation10]   ;;  %s1912_s12 = smov [#allocation11]  }
  0x53   : > { %s260_s9 = sshll.u32 %s1911_s22, 4  ;;  %s273_s14 = sshll.u32 %s1912_s12, 4  ;;  %s261_s9 = int_to_ptr.vmem [resolvable:$true] %s260_s9  ;;  %s274_s14 = int_to_ptr.vmem [resolvable:$true] %s273_s14 }
  0x54   : > { %s1740_s17 = scalar_lea.hbm %s2404_s4, 1024 }
  0x55   : > { %p1741_p13 = scmp.ne.s32.totalorder %s2404_s4, %s1740_s17  ;;  %p1747_p5 = scmp.lt.u32.totalorder %s1740_s17, %s2404_s4 }
  0x57   : > { %p1743_p0 = pnand %p1741_p13, %p2012_p8 }
  0x59   : > { %p1744_p2 = pneg %p1743_p0 }
  0x5b   : > { %p1749_p7 = pnand %p1747_p5, %p1744_p2 }
  0x5d   : > { %1752 = shalt.err (!%p1749_p7)
}
  0x5e   : > { %s1753_s13 = scalar_lea.vmem %s261_s9, 1024  ;;  %p1761_p11 = scmp.lt.s32.totalorder %s261_s9, %s261_s9 }
  0x5f   : > { %p1754_p9 = scmp.ne.s32.totalorder %s261_s9, %s1753_s13  ;;  %p1762_p12 = scmp.lt.s32.totalorder %s1753_s13, %s1753_s13 }
  0x61   : > { %p1756_p4 = pnand %p1754_p9, %p2012_p8  ;;  %p1763_p1 = por %p1762_p12, %p1761_p11 }
  0x63   : > { %p1757_p10 = pneg %p1756_p4 }
  0x65   : > { %p1764_p3 = pnand %p1763_p1, %p1757_p10 }
  0x67   : > { %1767 = shalt.err (!%p1764_p3)
}
  0x68   : > { %1531 = dma.hbm_to_vmem [thread:$0]  (!%p1996_p6), %s2404_s4, 1024, %s261_s9, [#allocation9], %s2410_s23, %s2410_s23, %s1910_s28  }
  0x69   : > { %s1768_s16 = scalar_lea.hbm %s2405_s5, 1024 }
  0x6a   : > { %p1769_p1 = scmp.ne.s32.totalorder %s2405_s5, %s1768_s16  ;;  %p1775_p0 = scmp.lt.u32.totalorder %s1768_s16, %s2405_s5 }
  0x6c   : > { %p1771_p3 = pnand %p1769_p1, %p2012_p8 }
  0x6e   : > { %p1772_p13 = pneg %p1771_p3 }
  0x70   : > { %p1777_p2 = pnand %p1775_p0, %p1772_p13 }
  0x72   : > { %1780 = shalt.err (!%p1777_p2)
}
  0x73   : > { %s1781_s21 = scalar_lea.vmem %s274_s14, 1024  ;;  %p1789_p4 = scmp.lt.s32.totalorder %s274_s14, %s274_s14 }
  0x74   : > { %p1782_p5 = scmp.ne.s32.totalorder %s274_s14, %s1781_s21  ;;  %p1790_p10 = scmp.lt.s32.totalorder %s1781_s21, %s1781_s21 }
  0x76   : > { %p1784_p7 = pnand %p1782_p5, %p2012_p8  ;;  %p1791_p11 = por %p1790_p10, %p1789_p4 }
  0x78   : > { %p1785_p9 = pneg %p1784_p7 }
  0x7a   : > { %p1792_p12 = pnand %p1791_p11, %p1785_p9 }
  0x7c   : > { %1795 = shalt.err (!%p1792_p12)
}
  0x7d   : > { %1534 = dma.hbm_to_vmem [thread:$0]  (!%p1996_p6), %s2405_s5, 1024, %s274_s14, [#allocation12], %s2410_s23, %s2410_s23, %s1910_s28  }
  0x7e   : > { %s1270_s11 = sadd.s32 4294967294, %s1904_s27   ;;  %s2132_s19 = sadd.s32 1, %s1904_s27  }
  0x7f   : > { %s33_s29 = sadd.s32 1, %s1900_s26  ;;  %s30_s22 = ssub.s32 %s1904_s27, %s2132_s19 }
  0x80   : > { %p40_p8 = scmp.ne.s32.totalorder %s1900_s26, %s1896_s25  ;;  %p31_p1 = scmp.eq.s32.totalorder %s30_s22, 0 }
  0x81   : > { %p41_p3 = scmp.eq.s32.totalorder %s1904_s27, 0  ;;  %p46_p13 = scmp.ne.s32.totalorder %s1896_s25, %s1892_s24 }
  0x82   : > { %p196_p0 = scmp.eq.s32.totalorder %s1980_s30, 1  ;;  %p2415_p5 = scmp.eq.s32.totalorder %s1980_s30, 0 }
  0x83   : > { %s2144_s12 = scalar_select %p31_p1, %s1900_s26, %s33_s29  }
  0x84   : > { %p42_p2 = por %p41_p3, %p40_p8  ;;  %p2148_p7 = por %p2415_p5, %p46_p13 }
  0x85   : > { %p2152_p6 = por %p196_p0, %p40_p8  ;;  %p202_p9 = scmp.eq.s32.totalorder %s1270_s11, 1 }
  0x86   : > { %p1548_p4 = scmp.lt.s32.totalorder %s1904_s27, 2  ;;  %s290_s16 = sand.u32 1, %s1900_s26  }
  0x87   : > { %s2417_s14 = scalar_select %p2152_p6, 1, 0 }
  0x88   : > { %p2158_p10 = por %p202_p9, %p46_p13  ;;  %s1278_s18 = sshll.u32 %s290_s16, 3 }
  0x89   : > { %s1348_s20 = sshll.u32 %s1904_s27, 7  ;;  %s294_s13 = scalar_lea.vmem [#allocation2], %s1278_s18 }
  0x8a   : > { %s2418_s17 = scalar_select %p2158_p10, 1, 0 }
  0x8b   : > { %s2166_s9 = scalar_lea.hbm %s2400_s0, %s1348_s20  ;;  %s301_s29 = sshll.u32 %s294_s13, 4  ;;  %s2172_s29 = int_to_ptr.vmem [resolvable:$true] %s301_s29 }
  0x8c   : > { %p2168_p11 = pnand %p1548_p4, %p42_p2  ;;  %s2174_s22 = scalar_lea.sflag [#allocation3], %s290_s16 }
  0x8d   : > { %s1796_s23 = scalar_lea.hbm %s2166_s9, 128  ;;  %s1801_s10 = scalar_lea.hbm %s2400_s0, 256 }
  0x8e   : > { %p1797_p12 = scmp.ne.s32.totalorder %s2166_s9, %s1796_s23  ;;  %p1798_p8 = pneg %p2168_p11 }
  0x8f   : > { %p1802_p13 = scmp.lt.u32.totalorder %s2166_s9, %s2400_s0  ;;  %p1803_p0 = scmp.lt.u32.totalorder %s1801_s10, %s1796_s23 }
  0x90   : > { %p1799_p1 = pnand %p1798_p8, %p1797_p12  ;;  %p1805_p5 = scmp.lt.u32.totalorder %s1796_s23, %s2166_s9 }
  0x91   : > { %p1804_p2 = por %p1803_p0, %p1802_p13 }
  0x92   : > { %p1800_p3 = pneg %p1799_p1 }
  0x93   : > { %p1806_p9 = por %p1805_p5, %p1804_p2 }
  0x95   : > { %p1807_p4 = pnand %p1806_p9, %p1800_p3 }
  0x97   : > { %1810 = shalt.err (!%p1807_p4)
}
  0x98   : > { %s1811_s16 = scalar_lea.vmem %s2172_s29, 128  ;;  %s1913_s18 = smov [#allocation2]  }
  0x99   : > { %p1812_p12 = scmp.ne.s32.totalorder %s2172_s29, %s1811_s16  ;;  %s1816_s20 = sshll.u32 %s1913_s18, 4  ;;  %s1817_s20 = int_to_ptr.vmem [resolvable:$false] %s1816_s20 }
  0x9a   : > { %s1818_s21 = scalar_lea.vmem %s1817_s20, 256  ;;  %p1819_p6 = scmp.lt.s32.totalorder %s2172_s29, %s1817_s20 }
  0x9b   : > { %p1814_p1 = pnand %p1812_p12, %p1798_p8  ;;  %p1820_p13 = scmp.lt.s32.totalorder %s1818_s21, %s1811_s16 }
  0x9d   : > { %p1815_p10 = pneg %p1814_p1  ;;  %p1821_p0 = por %p1820_p13, %p1819_p6 }
  0x9f   : > { %p1822_p2 = pnand %p1821_p0, %p1815_p10 }
  0xa1   : > { %1825 = shalt.err (!%p1822_p2)
}
  0xa2   : > { %s2420_s23 = smov 64   ;;  %p2421_p8 = scmp.ne.s32.totalorder %s2412_s8, 0 }
  0xa3   : > { %1538 = dma.hbm_to_vmem [thread:$0]  (!%p2168_p11), %s2166_s9, 128, %s2172_s29, %s2174_s22, %s2420_s23, %s2420_s23, %s1910_s28  }
  0xa4   : > { %313 = sbr.rel (%p2421_p8) target bundleno = 2031 (0x7ef), region = 48  ;;  %s2208_s10 = sand.u32 (!%p2421_p8), 1, %s1896_s25  }
  0xa5   : > { %s1282_s13 = sshll.u32 (!%p2421_p8), %s2208_s10, 3  ;;  %s316_s16 = scalar_lea.sflag (!%p2421_p8), [#allocation3], %s2208_s10 }
  0xa6   : > { %s2212_s18 = scalar_lea.vmem (!%p2421_p8), [#allocation2], %s1282_s13 }
  0xab   : > { %1871 = dma.done.wait (%p2148_p7), %s316_s16, 128  }
  0xac   : > { %1873 = vsyncadd (%p2148_p7), %s316_s16, 4294967168  ;;  %p2422_p6 = scmp.eq.s32.totalorder %s1980_s30, 0 }
  0xae   : > { %1875 = dma.done.wait (%p2422_p6), [#allocation6], 2048   ;;  %p2423_p10 = pmov %p2422_p6 }
  0xaf   : > { %p2424_p11 = pmov %p2422_p6 }
  0xb0   : > { %1877 = vsyncadd (%p2423_p10), [#allocation6], 4294965248 }
  0xb1   : > { %1879 = dma.done.wait (%p2424_p11), [#allocation9], 2048   ;;  %p2425_p3 = pmov %p2422_p6 }
  0xb3   : > { %1881 = vsyncadd (%p2425_p3), [#allocation9], 4294965248  ;;  %p2426_p5 = pmov %p2425_p3 }
  0xb4   : > { %p2427_p9 = pmov %p2425_p3 }
  0xb5   : > { %1883 = dma.done.wait (%p2426_p5), [#allocation12], 1024  }
  0xb6   : > { %1885 = vsyncadd (%p2427_p9), [#allocation12], 4294966272  ;;  %v1914_v0 = vmov 0.0   ;;  %vm1915_vm0 = vmmov 0   ;;  %v1598_v1 = vld [vmem:[#allocation5] sm:$0xff]   ;;  %v1599_v2 = vld [vmem:[#allocation5 + $0x8] sm:$0xff]  }
  0xb7   : > { %1395 = vmatprep.subr.bf16.mxu0 %v1914_v0  ;;  %1411 = vmatprep.mubr.msk.bf16.mxu0 %vm1915_vm0, %v1914_v0  ;;  %v1600_v3 = vld [vmem:[#allocation5 + $0x10] sm:$0xff]   ;;  %v1601_v4 = vld [vmem:[#allocation5 + $0x18] sm:$0xff]   ;;  %v1602_v5 = vld [vmem:[#allocation5 + $0x20] sm:$0xff]   ;;  %s1288_s16 = sshll.u32 %s2208_s10, 4  ;;  %s1349_s9 = sshll.u32 %s1980_s30, 8 }
  0xb8   : > { %1415 = vmatprep.subr.bf16.mxu1 %v1914_v0  ;;  %1431 = vmatprep.mubr.msk.bf16.mxu1 %vm1915_vm0, %v1914_v0  ;;  %v1603_v6 = vld [vmem:[#allocation5 + $0x28] sm:$0xff]   ;;  %v1604_v7 = vld [vmem:[#allocation5 + $0x30] sm:$0xff]   ;;  %v1605_v8 = vld [vmem:[#allocation5 + $0x38] sm:$0xff]   ;;  %s369_s28 = scalar_lea.vmem [#allocation13], %s1288_s16  ;;  %s2356_s22 = scalar_lea.hbm %s2407_s7, %s1349_s9 }
  0xb9   : > { %1396 = vmatpush3.bf16.msra.mxu0 %v1598_v1  ;;  %v2243_v9 = vld [vmem:[%s2212_s18] sm:$0xff]   ;;  %v1607_v19 = vld [vmem:[#allocation7] sm:$0xff]   ;;  %v1608_v20 = vld [vmem:[#allocation7 + $0x8] sm:$0xff]   ;;  %s1149_s15 = sshll.u32 %s369_s28, 4  ;;  %s1136_s20 = scalar_lea.sflag [#allocation4], %s2208_s10  ;;  %s2351_s15 = int_to_ptr.vmem [resolvable:$true] %s1149_s15 }
  0xba   : > { %1397 = vmatprep.subr.bf16.mxu0 %v1914_v0  ;;  %v1289_v10 = vld [vmem:[%s2406_s6] ss:$0 sm:$0xff]  ;;  %1416 = vmatpush3.bf16.msra.mxu1 %v1607_v19  ;;  %v1610_v22 = vld [vmem:[#allocation7 + $0x18] sm:$0xff]   ;;  %v1611_v23 = vld [vmem:[#allocation7 + $0x20] sm:$0xff]   ;;  %v375_v56 = vunpack.c.l.bf16 %v2243_v9  ;;  %v376_v57 = vunpack.c.h.bf16 %v2243_v9  ;;  %s1826_s21 = scalar_lea.vmem %s2351_s15, 256  ;;  %p2428_p4 = scmp.ne.s32.totalorder %s2417_s14, 0 }
  0xbb   : > { %1417 = vmatprep.subr.bf16.mxu1 %v1914_v0  ;;  %v1609_v21 = vld [vmem:[#allocation7 + $0x10] sm:$0xff]   ;;  %v1612_v24 = vld [vmem:[#allocation7 + $0x28] sm:$0xff]   ;;  %v1614_v26 = vld [vmem:[#allocation7 + $0x38] sm:$0xff]   ;;  %p1827_p7 = scmp.ne.s32.totalorder %s2351_s15, %s1826_s21  ;;  %s1916_s30 = smov [#allocation13]  }
  0xbc   : > { %v1613_v25 = vld [vmem:[#allocation7 + $0x30] sm:$0xff]   ;;  %s1830_s23 = sshll.u32 %s1916_s30, 4  ;;  %s1831_s23 = int_to_ptr.vmem [resolvable:$false] %s1830_s23 }
  0xbd   : > { %1398 = vmatpush3.bf16.msra.mxu0 %v1599_v2  ;;  %v1299_v45 = vld [vmem:[%s2406_s6 + $0x1] ss:$0 sm:$0xff]  ;;  %v1300_v47 = vld [vmem:[%s2406_s6 + $0x2] ss:$0 sm:$0xff]  ;;  %v1301_v1 = vld [vmem:[%s2406_s6 + $0x3] ss:$0 sm:$0xff]  ;;  %p1828_p12 = pnand %p1827_p7, %p2428_p4  ;;  %p1833_p13 = scmp.lt.s32.totalorder %s2351_s15, %s1831_s23 }
  0xbe   : > { %1399 = vmatprep.subr.bf16.mxu0 %v1914_v0  ;;  %1418 = vmatpush3.bf16.msra.mxu1 %v1608_v20  ;;  %s1832_s13 = scalar_lea.vmem %s1831_s23, 512 }
  0xbf   : > { %1419 = vmatprep.subr.bf16.mxu1 %v1914_v0  ;;  %p1829_p1 = pneg %p1828_p12  ;;  %p1834_p0 = scmp.lt.s32.totalorder %s1832_s13, %s1826_s21 }
  0xc1   : > { %1400 = vmatpush3.bf16.msra.mxu0 %v1600_v3  ;;  %p1835_p2 = por %p1834_p0, %p1833_p13 }
  0xc2   : > { %1401 = vmatprep.subr.bf16.mxu0 %v1914_v0  ;;  %1420 = vmatpush3.bf16.msra.mxu1 %v1609_v21 }
  0xc3   : > { %1421 = vmatprep.subr.bf16.mxu1 %v1914_v0  ;;  %p1836_p8 = pnand %p1835_p2, %p1829_p1 }
  0xc5   : > { %1402 = vmatpush3.bf16.msra.mxu0 %v1601_v4 }
  0xc6   : > { %1403 = vmatprep.subr.bf16.mxu0 %v1914_v0  ;;  %1422 = vmatpush3.bf16.msra.mxu1 %v1610_v22 }
  0xc7   : > { %1423 = vmatprep.subr.bf16.mxu1 %v1914_v0 }
  0xc9   : > { %1404 = vmatpush3.bf16.msra.mxu0 %v1602_v5 }
  0xca   : > { %1405 = vmatprep.subr.bf16.mxu0 %v1914_v0  ;;  %1424 = vmatpush3.bf16.msra.mxu1 %v1611_v23 }
  0xcb   : > { %1425 = vmatprep.subr.bf16.mxu1 %v1914_v0 }
  0xcd   : > { %1406 = vmatpush3.bf16.msra.mxu0 %v1603_v6 }
  0xce   : > { %1407 = vmatprep.subr.bf16.mxu0 %v1914_v0  ;;  %1426 = vmatpush3.bf16.msra.mxu1 %v1612_v24 }
  0xcf   : > { %1427 = vmatprep.subr.bf16.mxu1 %v1914_v0 }
  0xd1   : > { %1408 = vmatpush3.bf16.msra.mxu0 %v1604_v7 }
  0xd2   : > { %1409 = vmatprep.subr.bf16.mxu0 %v1914_v0  ;;  %1428 = vmatpush3.bf16.msra.mxu1 %v1613_v25 }
  0xd3   : > { %1429 = vmatprep.subr.bf16.mxu1 %v1914_v0 }
  0xd5   : > { %1410 = vmatpush3.bf16.msra.mxu0 %v1605_v8 }
  0xd6   : > { %1435 = vmatprep.subr.bf16.mxu0 %v1914_v0  ;;  %1430 = vmatpush3.bf16.msra.mxu1 %v1614_v26 }
  0xd7   : > { %1455 = vmatprep.subr.bf16.mxu1 %v1914_v0 }
  0xd8   : > { %1412 = vmatmul.mubr.bf16.vlgmr.msra.gmra.mrb[0].mxu0 %v2243_v9 }
  0xd9   : > { %1451 = vmatprep.mubr.msk.bf16.mxu0 %vm1915_vm0, %v1914_v0 }
 0x1ab   : > { %v488_v11 = vpop.f32.mrb[0].mxu0 }
 0x1ac   : > { %v489_v12 = vadd.f32 %v1289_v10, %v488_v11  ;;  %v1413_v13 = vpop.f32.mrb[1].mxu0  ;;  %v1616_v11 = vld [vmem:[#allocation8 + $0x8] sm:$0xff]  }
 0x1ad   : > { %v491_v14 = vpop.f32.mrb[2].mxu0  ;;  %v1618_v13 = vld [vmem:[#allocation8 + $0x18] sm:$0xff]  }
 0x1ae   : > { %v492_v15 = vadd.f32 %v1289_v10, %v491_v14  ;;  %495 = vadd.xlane.f32.xlu0 %v489_v12  ;;  %v1414_v16 = vpop.f32.mrb[3].mxu0  ;;  %v499_v17 = vmul.f32 %v489_v12, %v489_v12  ;;  %v1615_v10 = vld [vmem:[#allocation8] sm:$0xff]  }
 0x1af   : > { %1436 = vmatpush3.bf16.msra.mxu0 %v1615_v10  ;;  %v1619_v14 = vld [vmem:[#allocation8 + $0x20] sm:$0xff]   ;;  %v1621_v16 = vld [vmem:[#allocation8 + $0x30] sm:$0xff]  }
 0x1b0   : > { %501 = vadd.xlane.f32.xlu1 %v499_v17  ;;  %v500_v18 = vmul.f32 %v492_v15, %v492_v15  ;;  %1437 = vmatprep.subr.bf16.mxu0 %v1914_v0  ;;  %v1622_v17 = vld [vmem:[#allocation8 + $0x38] sm:$0xff]  }
 0x1b2   : > { %497 = vadd.xlane.f32.xlu0 %v492_v15 }
 0x1b3   : > { %1438 = vmatpush3.bf16.msra.mxu0 %v1616_v11 }
 0x1b4   : > { %503 = vadd.xlane.f32.xlu1 %v500_v18  ;;  %1439 = vmatprep.subr.bf16.mxu0 %v1914_v0 }
 0x23b   : > { %v496_v27 = vpop.xlane.xlu0 %495 }
 0x23c   : > { %v505_v28 = vmul.f32 0.03125, %v496_v27 }
 0x23d   : > { %v502_v29 = vpop.xlane.xlu1 %501 }
 0x23e   : > { %v509_v30 = vmul.f32 %v505_v28, %v505_v28  ;;  %v507_v31 = vmul.f32 0.03125, %v502_v29  ;;  %v515_v43 = vsub.f32 %v489_v12, %v505_v28  ;;  %v1617_v12 = vld [vmem:[#allocation8 + $0x10] sm:$0xff]  }
 0x23f   : > { %v498_v32 = vpop.xlane.xlu0 %497  ;;  %1440 = vmatpush3.bf16.msra.mxu0 %v1617_v12 }
 0x240   : > { %v511_v33 = vsub.f32 %v507_v31, %v509_v30  ;;  %v506_v34 = vmul.f32 0.03125, %v498_v32  ;;  %1441 = vmatprep.subr.bf16.mxu0 %v1914_v0 }
 0x241   : > { %v504_v35 = vpop.xlane.xlu1 %503 }
 0x242   : > { %v513_v36 = vmax.f32 %v511_v33, 0.0  ;;  %v510_v37 = vmul.f32 %v506_v34, %v506_v34  ;;  %v508_v38 = vmul.f32 0.03125, %v504_v35  ;;  %v516_v48 = vsub.f32 %v492_v15, %v506_v34  ;;  %v1620_v15 = vld [vmem:[#allocation8 + $0x28] sm:$0xff]  }
 0x243   : > { %1442 = vmatpush3.bf16.msra.mxu0 %v1618_v13 }
 0x244   : > { %v517_v39 = vadd.f32 1e-05, %v513_v36  ;;  %v512_v40 = vsub.f32 %v508_v38, %v510_v37  ;;  %1443 = vmatprep.subr.bf16.mxu0 %v1914_v0  ;;  %v1310_v36 = vld [vmem:[%s2406_s6 + $0x4] ss:$0 sm:$0xff] }
 0x246   : > { %1640 = vrsqrt.f32 %v517_v39  ;;  %v514_v41 = vmax.f32 %v512_v40, 0.0  ;;  %v1311_v40 = vld [vmem:[%s2406_s6 + $0x5] ss:$0 sm:$0xff] }
 0x247   : > { %1444 = vmatpush3.bf16.msra.mxu0 %v1619_v14 }
 0x248   : > { %v518_v42 = vadd.f32 1e-05, %v514_v41  ;;  %1445 = vmatprep.subr.bf16.mxu0 %v1914_v0 }
 0x24a   : > { %1642 = vrsqrt.f32 %v518_v42 }
 0x24b   : > { %1446 = vmatpush3.bf16.msra.mxu0 %v1620_v15 }
 0x24c   : > { %1447 = vmatprep.subr.bf16.mxu0 %v1914_v0 }
 0x24f   : > { %1448 = vmatpush3.bf16.msra.mxu0 %v1621_v16 }
 0x250   : > { %v1641_v44 = vpop.eup %1640  ;;  %1449 = vmatprep.subr.bf16.mxu0 %v1914_v0 }
 0x251   : > { %v521_v46 = vmul.f32 %v1641_v44, %v515_v43 }
 0x253   : > { %v527_v49 = vmul.f32 %v1299_v45, %v521_v46  ;;  %1450 = vmatpush3.bf16.msra.mxu0 %v1622_v17 }
 0x254   : > { %v1643_v50 = vpop.eup %1642  ;;  %1475 = vmatprep.subr.bf16.mxu0 %v1914_v0 }
 0x255   : > { %v522_v51 = vmul.f32 %v1643_v50, %v516_v48  ;;  %v533_v52 = vadd.f32 %v1300_v47, %v527_v49 }
 0x257   : > { %v528_v53 = vmul.f32 %v1299_v45, %v522_v51  ;;  %v535_v54 = vmul.f32 0.2, %v533_v52 }
 0x259   : > { %v534_v55 = vadd.f32 %v1300_v47, %v528_v53  ;;  %v537_v59 = vmax.f32 %v533_v52, %v535_v54  ;;  %v1312_v53 = vld [vmem:[%s2406_s6 + $0x6] ss:$0 sm:$0xff] }
 0x25b   : > { %v536_v58 = vmul.f32 0.2, %v534_v55  ;;  %v2269_v61 = vadd.f32 %v537_v59, %v375_v56 }
 0x25d   : > { %v538_v60 = vmax.f32 %v534_v55, %v536_v58 }
 0x25f   : > { %v2271_v62 = vadd.f32 %v538_v60, %v376_v57 }
 0x261   : > { %v544_v63 = vpack.c.bf16 %v2271_v62, %v2269_v61 }
 0x263   : > { %1432 = vmatmul.mubr.bf16.vlgmr.msra.gmra.mrb[0].mxu1 %v544_v63  ;;  %v1624_v63 = vld [vmem:[#allocation10 + $0x8] sm:$0xff]  }
 0x264   : > { %1471 = vmatprep.mubr.msk.bf16.mxu1 %vm1915_vm0, %v1914_v0 }
 0x336   : > { %v647_v2 = vpop.f32.mrb[0].mxu1 }
 0x337   : > { %v648_v3 = vadd.f32 %v1301_v1, %v647_v2  ;;  %v1433_v4 = vpop.f32.mrb[1].mxu1  ;;  %v1626_v2 = vld [vmem:[#allocation10 + $0x18] sm:$0xff]  }
 0x338   : > { %v650_v5 = vpop.f32.mrb[2].mxu1  ;;  %v1628_v4 = vld [vmem:[#allocation10 + $0x28] sm:$0xff]  }
 0x339   : > { %v651_v6 = vadd.f32 %v1301_v1, %v650_v5  ;;  %654 = vadd.xlane.f32.xlu0 %v648_v3  ;;  %v1434_v7 = vpop.f32.mrb[3].mxu1  ;;  %v658_v8 = vmul.f32 %v648_v3, %v648_v3  ;;  %v1625_v1 = vld [vmem:[#allocation10 + $0x10] sm:$0xff]  }
 0x33a   : > { %v1629_v5 = vld [vmem:[#allocation10 + $0x30] sm:$0xff]  }
 0x33b   : > { %656 = vadd.xlane.f32.xlu1 %v651_v6  ;;  %v659_v9 = vmul.f32 %v651_v6, %v651_v6 }
 0x33d   : > { %660 = vadd.xlane.f32.xlu0 %v658_v8 }
 0x33f   : > { %662 = vadd.xlane.f32.xlu1 %v659_v9 }
 0x3c6   : > { %v655_v18 = vpop.xlane.xlu0 %654 }
 0x3c7   : > { %v664_v19 = vmul.f32 0.03125, %v655_v18 }
 0x3c8   : > { %v657_v20 = vpop.xlane.xlu1 %656 }
 0x3c9   : > { %v665_v21 = vmul.f32 0.03125, %v657_v20  ;;  %v668_v23 = vmul.f32 %v664_v19, %v664_v19  ;;  %v674_v34 = vsub.f32 %v648_v3, %v664_v19  ;;  %v1627_v3 = vld [vmem:[#allocation10 + $0x20] sm:$0xff]  }
 0x3ca   : > { %v661_v22 = vpop.xlane.xlu0 %660 }
 0x3cb   : > { %v666_v24 = vmul.f32 0.03125, %v661_v22  ;;  %v669_v26 = vmul.f32 %v665_v21, %v665_v21  ;;  %v675_v37 = vsub.f32 %v651_v6, %v665_v21  ;;  %v1630_v6 = vld [vmem:[#allocation10 + $0x38] sm:$0xff]  }
 0x3cc   : > { %v663_v25 = vpop.xlane.xlu1 %662 }
 0x3cd   : > { %v670_v27 = vsub.f32 %v666_v24, %v668_v23  ;;  %v667_v28 = vmul.f32 0.03125, %v663_v25  ;;  %v1321_v25 = vld [vmem:[%s2406_s6 + $0x7] ss:$0 sm:$0xff] }
 0x3cf   : > { %v672_v29 = vmax.f32 %v670_v27, 0.0  ;;  %v671_v30 = vsub.f32 %v667_v28, %v669_v26 }
 0x3d1   : > { %v676_v31 = vadd.f32 1e-05, %v672_v29  ;;  %v673_v32 = vmax.f32 %v671_v30, 0.0  ;;  %v1322_v29 = vld [vmem:[%s2406_s6 + $0x8] ss:$0 sm:$0xff] }
 0x3d3   : > { %1644 = vrsqrt.f32 %v676_v31  ;;  %v677_v33 = vadd.f32 1e-05, %v673_v32 }
 0x3d5   : > { %1646 = vrsqrt.f32 %v677_v33 }
 0x3dd   : > { %v1645_v35 = vpop.eup %1644 }
 0x3de   : > { %v680_v38 = vmul.f32 %v1645_v35, %v674_v34 }
 0x3df   : > { %v1647_v39 = vpop.eup %1646 }
 0x3e0   : > { %v681_v41 = vmul.f32 %v1647_v39, %v675_v37  ;;  %v686_v42 = vmul.f32 %v1310_v36, %v680_v38 }
 0x3e2   : > { %v687_v43 = vmul.f32 %v1310_v36, %v681_v41  ;;  %v692_v44 = vadd.f32 %v1311_v40, %v686_v42  ;;  %v1323_v42 = vld [vmem:[%s2406_s6 + $0x9] ss:$0 sm:$0xff] }
 0x3e4   : > { %v693_v45 = vadd.f32 %v1311_v40, %v687_v43  ;;  %v694_v46 = vmul.f32 0.2, %v692_v44 }
 0x3e6   : > { %v695_v47 = vmul.f32 0.2, %v693_v45  ;;  %v696_v48 = vmax.f32 %v692_v44, %v694_v46 }
 0x3e8   : > { %v697_v49 = vmax.f32 %v693_v45, %v695_v47  ;;  %v2295_v50 = vadd.f32 %v696_v48, %v2269_v61 }
 0x3ea   : > { %v2298_v51 = vadd.f32 %v697_v49, %v2271_v62  ;;  %v1623_v62 = vld [vmem:[#allocation10] sm:$0xff]  }
 0x3eb   : > { %1456 = vmatpush3.bf16.msra.mxu1 %v1623_v62 }
 0x3ec   : > { %v703_v52 = vpack.c.bf16 %v2298_v51, %v2295_v50  ;;  %1457 = vmatprep.subr.bf16.mxu1 %v1914_v0 }
 0x3ee   : > { %1452 = vmatmul.mubr.bf16.vlgmr.msra.gmra.mrb[4].mxu0 %v703_v52  ;;  %v1632_v52 = vld [vmem:[#allocation11 + $0x8] sm:$0xff]  }
 0x3ef   : > { %1491 = vmatprep.mubr.msk.bf16.mxu0 %vm1915_vm0, %v1914_v0  ;;  %1458 = vmatpush3.bf16.msra.mxu1 %v1624_v63 }
 0x3f0   : > { %1459 = vmatprep.subr.bf16.mxu1 %v1914_v0 }
 0x3f3   : > { %1460 = vmatpush3.bf16.msra.mxu1 %v1625_v1 }
 0x3f4   : > { %1461 = vmatprep.subr.bf16.mxu1 %v1914_v0 }
 0x3f7   : > { %1462 = vmatpush3.bf16.msra.mxu1 %v1626_v2 }
 0x3f8   : > { %1463 = vmatprep.subr.bf16.mxu1 %v1914_v0 }
 0x3fb   : > { %1464 = vmatpush3.bf16.msra.mxu1 %v1627_v3 }
 0x3fc   : > { %1465 = vmatprep.subr.bf16.mxu1 %v1914_v0 }
 0x3ff   : > { %1466 = vmatpush3.bf16.msra.mxu1 %v1628_v4 }
 0x400   : > { %1467 = vmatprep.subr.bf16.mxu1 %v1914_v0 }
 0x403   : > { %1468 = vmatpush3.bf16.msra.mxu1 %v1629_v5 }
 0x404   : > { %1469 = vmatprep.subr.bf16.mxu1 %v1914_v0 }
 0x407   : > { %1470 = vmatpush3.bf16.msra.mxu1 %v1630_v6 }
 0x4c1   : > { %v806_v54 = vpop.f32.mrb[4].mxu0 }
 0x4c2   : > { %v807_v55 = vadd.f32 %v1312_v53, %v806_v54  ;;  %v1453_v56 = vpop.f32.mrb[5].mxu0  ;;  %v1634_v54 = vld [vmem:[#allocation11 + $0x18] sm:$0xff]  }
 0x4c3   : > { %v809_v57 = vpop.f32.mrb[6].mxu0  ;;  %v1636_v56 = vld [vmem:[#allocation11 + $0x28] sm:$0xff]  }
 0x4c4   : > { %v810_v58 = vadd.f32 %v1312_v53, %v809_v57  ;;  %813 = vadd.xlane.f32.xlu0 %v807_v55  ;;  %v1454_v59 = vpop.f32.mrb[7].mxu0  ;;  %v817_v60 = vmul.f32 %v807_v55, %v807_v55  ;;  %v1633_v53 = vld [vmem:[#allocation11 + $0x10] sm:$0xff]  }
 0x4c5   : > { %v1637_v57 = vld [vmem:[#allocation11 + $0x30] sm:$0xff]  }
 0x4c6   : > { %815 = vadd.xlane.f32.xlu1 %v810_v58  ;;  %v818_v61 = vmul.f32 %v810_v58, %v810_v58 }
 0x4c8   : > { %819 = vadd.xlane.f32.xlu0 %v817_v60 }
 0x4ca   : > { %821 = vadd.xlane.f32.xlu1 %v818_v61 }
 0x551   : > { %v814_v7 = vpop.xlane.xlu0 %813 }
 0x552   : > { %v823_v8 = vmul.f32 0.03125, %v814_v7 }
 0x553   : > { %v816_v9 = vpop.xlane.xlu1 %815 }
 0x554   : > { %v824_v10 = vmul.f32 0.03125, %v816_v9  ;;  %v827_v12 = vmul.f32 %v823_v8, %v823_v8  ;;  %v833_v23 = vsub.f32 %v807_v55, %v823_v8  ;;  %v1635_v55 = vld [vmem:[#allocation11 + $0x20] sm:$0xff]  }
 0x555   : > { %v820_v11 = vpop.xlane.xlu0 %819 }
 0x556   : > { %v825_v13 = vmul.f32 0.03125, %v820_v11  ;;  %v828_v15 = vmul.f32 %v824_v10, %v824_v10  ;;  %v834_v26 = vsub.f32 %v810_v58, %v824_v10  ;;  %v1638_v58 = vld [vmem:[#allocation11 + $0x38] sm:$0xff]  }
 0x557   : > { %v822_v14 = vpop.xlane.xlu1 %821 }
 0x558   : > { %v829_v16 = vsub.f32 %v825_v13, %v827_v12  ;;  %v826_v17 = vmul.f32 0.03125, %v822_v14  ;;  %v1332_v13 = vld [vmem:[%s2406_s6 + $0xa] ss:$0 sm:$0xff] }
 0x55a   : > { %v831_v18 = vmax.f32 %v829_v16, 0.0  ;;  %v830_v19 = vsub.f32 %v826_v17, %v828_v15  ;;  %v1333_v17 = vld [vmem:[%s2406_s6 + $0xb] ss:$0 sm:$0xff] }
 0x55c   : > { %v835_v20 = vadd.f32 1e-05, %v831_v18  ;;  %v832_v21 = vmax.f32 %v830_v19, 0.0 }
 0x55e   : > { %1648 = vrsqrt.f32 %v835_v20  ;;  %v836_v22 = vadd.f32 1e-05, %v832_v21 }
 0x560   : > { %1650 = vrsqrt.f32 %v836_v22 }
 0x568   : > { %v1649_v24 = vpop.eup %1648 }
 0x569   : > { %v839_v27 = vmul.f32 %v1649_v24, %v833_v23 }
 0x56a   : > { %v1651_v28 = vpop.eup %1650 }
 0x56b   : > { %v840_v30 = vmul.f32 %v1651_v28, %v834_v26  ;;  %v845_v31 = vmul.f32 %v1321_v25, %v839_v27 }
 0x56d   : > { %v846_v32 = vmul.f32 %v1321_v25, %v840_v30  ;;  %v851_v33 = vadd.f32 %v1322_v29, %v845_v31  ;;  %v1334_v30 = vld [vmem:[%s2406_s6 + $0xc] ss:$0 sm:$0xff] }
 0x56f   : > { %v852_v34 = vadd.f32 %v1322_v29, %v846_v32  ;;  %v853_v35 = vmul.f32 0.2, %v851_v33 }
 0x571   : > { %v854_v36 = vmul.f32 0.2, %v852_v34  ;;  %v855_v37 = vmax.f32 %v851_v33, %v853_v35 }
 0x573   : > { %v856_v38 = vmax.f32 %v852_v34, %v854_v36  ;;  %v2321_v39 = vadd.f32 %v855_v37, %v2295_v50 }
 0x575   : > { %v2324_v40 = vadd.f32 %v856_v38, %v2298_v51  ;;  %v1631_v51 = vld [vmem:[#allocation11] sm:$0xff]  }
 0x576   : > { %1476 = vmatpush3.bf16.msra.mxu0 %v1631_v51 }
 0x577   : > { %v862_v41 = vpack.c.bf16 %v2324_v40, %v2321_v39  ;;  %1477 = vmatprep.subr.bf16.mxu0 %v1914_v0 }
 0x579   : > { %1472 = vmatmul.mubr.bf16.vlgmr.msra.gmra.mrb[4].mxu1 %v862_v41 }
 0x57a   : > { %1478 = vmatpush3.bf16.msra.mxu0 %v1632_v52 }
 0x57b   : > { %1479 = vmatprep.subr.bf16.mxu0 %v1914_v0 }
 0x57e   : > { %1480 = vmatpush3.bf16.msra.mxu0 %v1633_v53 }
 0x57f   : > { %1481 = vmatprep.subr.bf16.mxu0 %v1914_v0 }
 0x582   : > { %1482 = vmatpush3.bf16.msra.mxu0 %v1634_v54 }
 0x583   : > { %1483 = vmatprep.subr.bf16.mxu0 %v1914_v0 }
 0x586   : > { %1484 = vmatpush3.bf16.msra.mxu0 %v1635_v55 }
 0x587   : > { %1485 = vmatprep.subr.bf16.mxu0 %v1914_v0 }
 0x58a   : > { %1486 = vmatpush3.bf16.msra.mxu0 %v1636_v56 }
 0x58b   : > { %1487 = vmatprep.subr.bf16.mxu0 %v1914_v0 }
 0x58e   : > { %1488 = vmatpush3.bf16.msra.mxu0 %v1637_v57 }
 0x58f   : > { %1489 = vmatprep.subr.bf16.mxu0 %v1914_v0 }
 0x592   : > { %1490 = vmatpush3.bf16.msra.mxu0 %v1638_v58 }
 0x64c   : > { %v965_v43 = vpop.f32.mrb[4].mxu1 }
 0x64d   : > { %v966_v44 = vadd.f32 %v1323_v42, %v965_v43  ;;  %v1473_v45 = vpop.f32.mrb[5].mxu1 }
 0x64e   : > { %v968_v46 = vpop.f32.mrb[6].mxu1 }
 0x64f   : > { %v969_v47 = vadd.f32 %v1323_v42, %v968_v46  ;;  %972 = vadd.xlane.f32.xlu0 %v966_v44  ;;  %v1474_v48 = vpop.f32.mrb[7].mxu1  ;;  %v976_v49 = vmul.f32 %v966_v44, %v966_v44 }
 0x651   : > { %974 = vadd.xlane.f32.xlu1 %v969_v47  ;;  %v977_v50 = vmul.f32 %v969_v47, %v969_v47 }
 0x653   : > { %978 = vadd.xlane.f32.xlu0 %v976_v49 }
 0x655   : > { %980 = vadd.xlane.f32.xlu1 %v977_v50 }
 0x6dc   : > { %v973_v59 = vpop.xlane.xlu0 %972 }
 0x6dd   : > { %v982_v60 = vmul.f32 0.03125, %v973_v59 }
 0x6de   : > { %v975_v61 = vpop.xlane.xlu1 %974 }
 0x6df   : > { %v983_v62 = vmul.f32 0.03125, %v975_v61  ;;  %v986_v1 = vmul.f32 %v982_v60, %v982_v60  ;;  %v992_v0 = vsub.f32 %v966_v44, %v982_v60 }
 0x6e0   : > { %v979_v63 = vpop.xlane.xlu0 %978 }
 0x6e1   : > { %v984_v2 = vmul.f32 0.03125, %v979_v63  ;;  %v987_v4 = vmul.f32 %v983_v62, %v983_v62  ;;  %v993_v14 = vsub.f32 %v969_v47, %v983_v62 }
 0x6e2   : > { %v981_v3 = vpop.xlane.xlu1 %980 }
 0x6e3   : > { %v988_v5 = vsub.f32 %v984_v2, %v986_v1  ;;  %v985_v6 = vmul.f32 0.03125, %v981_v3 }
 0x6e5   : > { %v990_v7 = vmax.f32 %v988_v5, 0.0  ;;  %v989_v8 = vsub.f32 %v985_v6, %v987_v4 }
 0x6e7   : > { %v994_v9 = vadd.f32 1e-05, %v990_v7  ;;  %v991_v10 = vmax.f32 %v989_v8, 0.0 }
 0x6e9   : > { %1652 = vrsqrt.f32 %v994_v9  ;;  %v995_v11 = vadd.f32 1e-05, %v991_v10 }
 0x6eb   : > { %1654 = vrsqrt.f32 %v995_v11 }
 0x6f3   : > { %v1653_v12 = vpop.eup %1652 }
 0x6f4   : > { %v998_v15 = vmul.f32 %v1653_v12, %v992_v0 }
 0x6f5   : > { %v1655_v16 = vpop.eup %1654 }
 0x6f6   : > { %v999_v18 = vmul.f32 %v1655_v16, %v993_v14  ;;  %v1004_v19 = vmul.f32 %v1332_v13, %v998_v15 }
 0x6f8   : > { %v1005_v20 = vmul.f32 %v1332_v13, %v999_v18  ;;  %v1010_v21 = vadd.f32 %v1333_v17, %v1004_v19 }
 0x6fa   : > { %v1011_v22 = vadd.f32 %v1333_v17, %v1005_v20  ;;  %v1012_v23 = vmul.f32 0.2, %v1010_v21 }
 0x6fc   : > { %v1013_v24 = vmul.f32 0.2, %v1011_v22  ;;  %v1014_v25 = vmax.f32 %v1010_v21, %v1012_v23 }
 0x6fe   : > { %v1015_v26 = vmax.f32 %v1011_v22, %v1013_v24  ;;  %v1016_v27 = vadd.f32 %v1014_v25, %v2321_v39 }
 0x700   : > { %v1017_v28 = vadd.f32 %v1015_v26, %v2324_v40 }
 0x702   : > { %v1018_v29 = vpack.c.bf16 %v1017_v28, %v1016_v27 }
 0x704   : > { %1492 = vmatmul.mubr.bf16.vlgmr.msra.gmra.mrb[8].mxu0 %v1018_v29 }
 0x7d7   : > { %v1122_v31 = vpop.f32.mrb[8].mxu0 }
 0x7d8   : > { %v1123_v32 = vadd.f32 %v1334_v30, %v1122_v31  ;;  %v1493_v33 = vpop.f32.mrb[9].mxu0 }
 0x7d9   : > { %v1125_v34 = vpop.f32.mrb[10].mxu0 }
 0x7da   : > { %v1129_v35 = vmul.f32 0.2, %v1123_v32  ;;  %v1126_v36 = vadd.f32 %v1334_v30, %v1125_v34  ;;  %v1494_v37 = vpop.f32.mrb[11].mxu0 }
 0x7dc   : > { %v1131_v38 = vmax.f32 %v1123_v32, %v1129_v35  ;;  %v1130_v39 = vmul.f32 0.2, %v1126_v36 }
 0x7de   : > { %1133 = vst [vmem:[%s369_s28] sm:$0xff] %v1131_v38  ;;  %v1132_v40 = vmax.f32 %v1126_v36, %v1130_v39 }
 0x7e0   : > { %1134 = vst [vmem:[%s369_s28 + $0x8] sm:$0xff] %v1132_v40 }
 0x7e1   : > { %1839 = shalt.err (!%p1836_p8)
}
 0x7e2   : > { %s1840_s16 = scalar_lea.hbm %s2356_s22, 256  ;;  %s1844_s28 = scalar_lea.hbm %s2407_s7, 512 }
 0x7e3   : > { %p1841_p6 = scmp.ne.s32.totalorder %s2356_s22, %s1840_s16  ;;  %p1845_p3 = scmp.lt.u32.totalorder %s2356_s22, %s2407_s7 }
 0x7e4   : > { %p1846_p5 = scmp.lt.u32.totalorder %s1844_s28, %s1840_s16  ;;  %p1848_p7 = scmp.lt.u32.totalorder %s1840_s16, %s2356_s22 }
 0x7e5   : > { %p1842_p10 = pnand %p1841_p6, %p2428_p4 }
 0x7e6   : > { %p1847_p9 = por %p1846_p5, %p1845_p3 }
 0x7e7   : > { %p1843_p11 = pneg %p1842_p10 }
 0x7e8   : > { %p1849_p12 = por %p1848_p7, %p1847_p9 }
 0x7ea   : > { %p1850_p1 = pnand %p1849_p12, %p1843_p11 }
 0x7ec   : > { %1853 = shalt.err (!%p1850_p1)
}
 0x7ed   : > { %s1917_s11 = smov 128   ;;  %s1918_s21 = smov 8  }
 0x7ee   : > { %1517 = dma.vmem_to_hbm [thread:$0]  (%p2428_p4), %s2351_s15, 256, %s2356_s22, %s1136_s20, %s1917_s11, %s1917_s11, %s1918_s21  }
 0x7ef PF: > { %s1164_s30 = sand.u32 1, %s1892_s24   ;;  %p2429_p13 = scmp.ne.s32.totalorder %s2418_s17, 0 }
 0x7f0   : > { %p2430_p0 = scmp.ge.s32.totalorder %s1904_s27, 2  ;;  %s1165_s23 = scalar_lea.sflag [#allocation4], %s1164_s30 }
 0x7f2   : > { %p1540_p2 = pnand %p2430_p0, %p2429_p13 }
 0x7f4   : > { %1887 = dma.done.wait (!%p1540_p2), %s1165_s23, 256  }
 0x7f5   : > { %1889 = vsyncadd (!%p1540_p2), %s1165_s23, 4294967040  ;;  %p23_p8 = scmp.ge.s32.totalorder %s2132_s19, 4   ;;  %s2431_s24 = smov %s1896_s25 }
 0x7f6   : > { %s2432_s25 = smov %s1900_s26  ;;  %s2433_s26 = smov %s2144_s12 }
 0x7f7   : > { %s2434_s27 = smov %s2132_s19  ;;  %25 = sbr.rel (!%p23_p8) target bundleno = 8 (0x8), region = 113 }
 0x7fe   :  { %1170 = vsyncpa [#allocation3], 1 }
 0x7ff   :  { %1172 = vsyncpa [#allocation3 + $0x1], 1 }
 0x800   :  { %1173 = vsyncpa [#allocation6], 1 }
 0x801   :  { %1174 = vsyncpa [#allocation9], 1 }
 0x802   :  { %1175 = vsyncpa [#allocation12], 1 }
 0x803   :  { %1176 = vsyncpa [#allocation4], 1 }
 0x804   :  { %1178 = vsyncpa [#allocation4 + $0x1], 1 }

// kernel: tpu_custom_call.1
= control target key start
LH: loop header
LB: loop body
LE: loop exit
PB: predicated region body
PF: predicated region fallthrough
CT: control target
= control target key end

     0   :  { %12 = vsyncpa [#allocation3], 0  ;;  %s2400_s0 = inlined_call_operand.hbm [shape: bf16[32,128], index: 0, kind: input, shape index: {}]   ;;  %s2401_s1 = inlined_call_operand.hbm [shape: bf16[128,128], index: 1, kind: input, shape index: {}]   ;;  %s2402_s2 = inlined_call_operand.hbm [shape: bf16[128,128], index: 2, kind: input, shape index: {}]   ;;  %s2403_s3 = inlined_call_operand.hbm [shape: bf16[128,128], index: 3, kind: input, shape index: {}]   ;;  %s2404_s4 = inlined_call_operand.hbm [shape: bf16[128,128], index: 4, kind: input, shape index: {}]   ;;  %s2405_s5 = inlined_call_operand.hbm [shape: bf16[128,128], index: 5, kind: input, shape index: {}]   ;;  %s2406_s6 = inlined_call_operand.vmem [shape: f32[16,128], index: 6, kind: input, shape index: {}]   ;;  %s2407_s7 = inlined_call_operand.hbm [shape: f32[32,128], index: 7, kind: output, shape index: {}]  }
   0x1   :  { %14 = vsyncpa [#allocation3 + $0x1], 0 }
   0x2   :  { %15 = vsyncpa [#allocation6], 0 }
   0x3   :  { %16 = vsyncpa [#allocation9], 0 }
   0x4   :  { %17 = vsyncpa [#allocation12], 0 }
   0x5   :  { %18 = vsyncpa [#allocation4], 0 }
   0x6   :  { %20 = vsyncpa [#allocation4 + $0x1], 0  ;;  %s1959_s24 = smov 0   ;;  %s1961_s25 = smov 0  }
   0x7   :  { %s1963_s26 = smov 0   ;;  %s1965_s27 = smov 0  }
   0x8 LB: > { %s1906_s28 = smov [#allocation5]   ;;  %s1980_s30 = sadd.s32 4294967295, %s1904_s27   ;;  %s1904_s27 = sphi %s1965_s27, %s2434_s27   ;;  %s1900_s26 = sphi %s1963_s26, %s2433_s26   ;;  %s1896_s25 = sphi %s1961_s25, %s2432_s25   ;;  %s1892_s24 = sphi %s1959_s24, %s2431_s24  }
   0x9   : > { %s221_s29 = sshll.u32 %s1906_s28, 4  ;;  %p1271_p0 = scmp.ge.s32.totalorder %s1904_s27, 1  ;;  %s1985_s29 = int_to_ptr.vmem [resolvable:$true] %s221_s29 }
   0xa   : > { %p2408_p1 = scmp.eq.s32.totalorder %s1980_s30, 0  ;;  %p209_p2 = scmp.lt.s32.totalorder %s1904_s27, 3 }
   0xb   : > { %s1907_s9 = smov [#allocation8]   ;;  %s1908_s12 = smov [#allocation7]  }
   0xc   : > { %p1987_p3 = pnand %p1271_p0, %p209_p2  ;;  %s247_s10 = sshll.u32 %s1907_s9, 4  ;;  %s2000_s10 = int_to_ptr.vmem [resolvable:$true] %s247_s10 }
   0xd   : > { %s234_s13 = sshll.u32 %s1908_s12, 4  ;;  %s1656_s16 = scalar_lea.hbm %s2401_s1, 1024  ;;  %s2002_s13 = int_to_ptr.vmem [resolvable:$true] %s234_s13 }
   0xe   : > { %s2412_s8 = scalar_select %p1987_p3, 1, 0 }
   0xf   : > { %p1519_p5 = pneg %p1987_p3  ;;  %p1657_p7 = scmp.ne.s32.totalorder %s2401_s1, %s1656_s16 }
  0x10   : > { %p1663_p11 = scmp.lt.u32.totalorder %s1656_s16, %s2401_s1 }
  0x11   : > { %p1996_p6 = pnand %p1519_p5, %p2408_p1 }
  0x13   : > { %p2012_p8 = pneg %p1996_p6 }
  0x15   : > { %p1659_p9 = pnand %p2012_p8, %p1657_p7 }
  0x17   : > { %p1660_p10 = pneg %p1659_p9 }
  0x19   : > { %p1665_p12 = pnand %p1663_p11, %p1660_p10 }
  0x1b   : > { %1668 = shalt.err (!%p1665_p12)
}
  0x1c   : > { %s1669_s22 = scalar_lea.vmem %s1985_s29, 1024  ;;  %p1677_p5 = scmp.lt.s32.totalorder %s1985_s29, %s1985_s29 }
  0x1d   : > { %p1670_p13 = scmp.ne.s32.totalorder %s1985_s29, %s1669_s22  ;;  %p1678_p4 = scmp.lt.s32.totalorder %s1669_s22, %s1669_s22 }
  0x1f   : > { %p1672_p0 = pnand %p1670_p13, %p2012_p8  ;;  %p1679_p7 = por %p1678_p4, %p1677_p5 }
  0x21   : > { %p1673_p2 = pneg %p1672_p0 }
  0x23   : > { %p1680_p9 = pnand %p1679_p7, %p1673_p2 }
  0x25   : > { %1683 = shalt.err (!%p1680_p9)
}
  0x26   : > { %s2410_s23 = smov 64   ;;  %s1910_s28 = smov 4  }
  0x27   : > { %1522 = dma.hbm_to_vmem [thread:$0]  (!%p1996_p6), %s2401_s1, 1024, %s1985_s29, [#allocation6], %s2410_s23, %s2410_s23, %s1910_s28  }
  0x28   : > { %s1684_s16 = scalar_lea.hbm %s2403_s3, 1024 }
  0x29   : > { %p1685_p4 = scmp.ne.s32.totalorder %s2403_s3, %s1684_s16  ;;  %p1691_p12 = scmp.lt.u32.totalorder %s1684_s16, %s2403_s3 }
  0x2b   : > { %p1687_p10 = pnand %p1685_p4, %p2012_p8 }
  0x2d   : > { %p1688_p11 = pneg %p1687_p10 }
  0x2f   : > { %p1693_p13 = pnand %p1691_p12, %p1688_p11 }
  0x31   : > { %1696 = shalt.err (!%p1693_p13)
}
  0x32   : > { %s1697_s29 = scalar_lea.vmem %s2000_s10, 1024  ;;  %p1705_p7 = scmp.lt.s32.totalorder %s2000_s10, %s2000_s10 }
  0x33   : > { %p1698_p0 = scmp.ne.s32.totalorder %s2000_s10, %s1697_s29  ;;  %p1706_p9 = scmp.lt.s32.totalorder %s1697_s29, %s1697_s29 }
  0x35   : > { %p1700_p2 = pnand %p1698_p0, %p2012_p8  ;;  %p1707_p4 = por %p1706_p9, %p1705_p7 }
  0x37   : > { %p1701_p5 = pneg %p1700_p2 }
  0x39   : > { %p1708_p10 = pnand %p1707_p4, %p1701_p5 }
  0x3b   : > { %1711 = shalt.err (!%p1708_p10)
}
  0x3c   : > { %1528 = dma.hbm_to_vmem [thread:$0]  (!%p1996_p6), %s2403_s3, 1024, %s2000_s10, [#allocation9], %s2410_s23, %s2410_s23, %s1910_s28  }
  0x3d   : > { %s1712_s15 = scalar_lea.hbm %s2402_s2, 1024 }
  0x3e   : > { %p1713_p11 = scmp.ne.s32.totalorder %s2402_s2, %s1712_s15  ;;  %p1719_p0 = scmp.lt.u32.totalorder %s1712_s15, %s2402_s2 }
  0x40   : > { %p1715_p12 = pnand %p1713_p11, %p2012_p8 }
  0x42   : > { %p1716_p13 = pneg %p1715_p12 }
  0x44   : > { %p1721_p2 = pnand %p1719_p0, %p1716_p13 }
  0x46   : > { %1724 = shalt.err (!%p1721_p2)
}
  0x47   : > { %s1725_s10 = scalar_lea.vmem %s2002_s13, 1024  ;;  %p1733_p4 = scmp.lt.s32.totalorder %s2002_s13, %s2002_s13 }
  0x48   : > { %p1726_p5 = scmp.ne.s32.totalorder %s2002_s13, %s1725_s10  ;;  %p1734_p10 = scmp.lt.s32.totalorder %s1725_s10, %s1725_s10 }
  0x4a   : > { %p1728_p7 = pnand %p1726_p5, %p2012_p8  ;;  %p1735_p11 = por %p1734_p10, %p1733_p4 }
  0x4c   : > { %p1729_p9 = pneg %p1728_p7 }
  0x4e   : > { %p1736_p12 = pnand %p1735_p11, %p1729_p9 }
  0x50   : > { %1739 = shalt.err (!%p1736_p12)
}
  0x51   : > { %1525 = dma.hbm_to_vmem [thread:$0]  (!%p1996_p6), %s2402_s2, 1024, %s2002_s13, [#allocation6], %s2410_s23, %s2410_s23, %s1910_s28  }
  0x52   : > { %s1911_s22 = smov [#allocation10]   ;;  %s1912_s12 = smov [#allocation11]  }
  0x53   : > { %s260_s9 = sshll.u32 %s1911_s22, 4  ;;  %s273_s14 = sshll.u32 %s1912_s12, 4  ;;  %s261_s9 = int_to_ptr.vmem [resolvable:$true] %s260_s9  ;;  %s274_s14 = int_to_ptr.vmem [resolvable:$true] %s273_s14 }
  0x54   : > { %s1740_s17 = scalar_lea.hbm %s2404_s4, 1024 }
  0x55   : > { %p1741_p13 = scmp.ne.s32.totalorder %s2404_s4, %s1740_s17  ;;  %p1747_p5 = scmp.lt.u32.totalorder %s1740_s17, %s2404_s4 }
  0x57   : > { %p1743_p0 = pnand %p1741_p13, %p2012_p8 }
  0x59   : > { %p1744_p2 = pneg %p1743_p0 }
  0x5b   : > { %p1749_p7 = pnand %p1747_p5, %p1744_p2 }
  0x5d   : > { %1752 = shalt.err (!%p1749_p7)
}
  0x5e   : > { %s1753_s13 = scalar_lea.vmem %s261_s9, 1024  ;;  %p1761_p11 = scmp.lt.s32.totalorder %s261_s9, %s261_s9 }
  0x5f   : > { %p1754_p9 = scmp.ne.s32.totalorder %s261_s9, %s1753_s13  ;;  %p1762_p12 = scmp.lt.s32.totalorder %s1753_s13, %s1753_s13 }
  0x61   : > { %p1756_p4 = pnand %p1754_p9, %p2012_p8  ;;  %p1763_p1 = por %p1762_p12, %p1761_p11 }
  0x63   : > { %p1757_p10 = pneg %p1756_p4 }
  0x65   : > { %p1764_p3 = pnand %p1763_p1, %p1757_p10 }
  0x67   : > { %1767 = shalt.err (!%p1764_p3)
}
  0x68   : > { %1531 = dma.hbm_to_vmem [thread:$0]  (!%p1996_p6), %s2404_s4, 1024, %s261_s9, [#allocation9], %s2410_s23, %s2410_s23, %s1910_s28  }
  0x69   : > { %s1768_s16 = scalar_lea.hbm %s2405_s5, 1024 }
  0x6a   : > { %p1769_p1 = scmp.ne.s32.totalorder %s2405_s5, %s1768_s16  ;;  %p1775_p0 = scmp.lt.u32.totalorder %s1768_s16, %s2405_s5 }
  0x6c   : > { %p1771_p3 = pnand %p1769_p1, %p2012_p8 }
  0x6e   : > { %p1772_p13 = pneg %p1771_p3 }
  0x70   : > { %p1777_p2 = pnand %p1775_p0, %p1772_p13 }
  0x72   : > { %1780 = shalt.err (!%p1777_p2)
}
  0x73   : > { %s1781_s21 = scalar_lea.vmem %s274_s14, 1024  ;;  %p1789_p4 = scmp.lt.s32.totalorder %s274_s14, %s274_s14 }
  0x74   : > { %p1782_p5 = scmp.ne.s32.totalorder %s274_s14, %s1781_s21  ;;  %p1790_p10 = scmp.lt.s32.totalorder %s1781_s21, %s1781_s21 }
  0x76   : > { %p1784_p7 = pnand %p1782_p5, %p2012_p8  ;;  %p1791_p11 = por %p1790_p10, %p1789_p4 }
  0x78   : > { %p1785_p9 = pneg %p1784_p7 }
  0x7a   : > { %p1792_p12 = pnand %p1791_p11, %p1785_p9 }
  0x7c   : > { %1795 = shalt.err (!%p1792_p12)
}
  0x7d   : > { %1534 = dma.hbm_to_vmem [thread:$0]  (!%p1996_p6), %s2405_s5, 1024, %s274_s14, [#allocation12], %s2410_s23, %s2410_s23, %s1910_s28  }
  0x7e   : > { %s1270_s11 = sadd.s32 4294967294, %s1904_s27   ;;  %s2132_s19 = sadd.s32 1, %s1904_s27  }
  0x7f   : > { %s33_s29 = sadd.s32 1, %s1900_s26  ;;  %s30_s22 = ssub.s32 %s1904_s27, %s2132_s19 }
  0x80   : > { %p40_p8 = scmp.ne.s32.totalorder %s1900_s26, %s1896_s25  ;;  %p31_p1 = scmp.eq.s32.totalorder %s30_s22, 0 }
  0x81   : > { %p41_p3 = scmp.eq.s32.totalorder %s1904_s27, 0  ;;  %p46_p13 = scmp.ne.s32.totalorder %s1896_s25, %s1892_s24 }
  0x82   : > { %p196_p0 = scmp.eq.s32.totalorder %s1980_s30, 1  ;;  %p2415_p5 = scmp.eq.s32.totalorder %s1980_s30, 0 }
  0x83   : > { %s2144_s12 = scalar_select %p31_p1, %s1900_s26, %s33_s29  }
  0x84   : > { %p42_p2 = por %p41_p3, %p40_p8  ;;  %p2148_p7 = por %p2415_p5, %p46_p13 }
  0x85   : > { %p2152_p6 = por %p196_p0, %p40_p8  ;;  %p202_p9 = scmp.eq.s32.totalorder %s1270_s11, 1 }
  0x86   : > { %p1548_p4 = scmp.lt.s32.totalorder %s1904_s27, 2  ;;  %s290_s16 = sand.u32 1, %s1900_s26  }
  0x87   : > { %s2417_s14 = scalar_select %p2152_p6, 1, 0 }
  0x88   : > { %p2158_p10 = por %p202_p9, %p46_p13  ;;  %s1278_s18 = sshll.u32 %s290_s16, 3 }
  0x89   : > { %s1348_s20 = sshll.u32 %s1904_s27, 7  ;;  %s294_s13 = scalar_lea.vmem [#allocation2], %s1278_s18 }
  0x8a   : > { %s2418_s17 = scalar_select %p2158_p10, 1, 0 }
  0x8b   : > { %s2166_s9 = scalar_lea.hbm %s2400_s0, %s1348_s20  ;;  %s301_s29 = sshll.u32 %s294_s13, 4  ;;  %s2172_s29 = int_to_ptr.vmem [resolvable:$true] %s301_s29 }
  0x8c   : > { %p2168_p11 = pnand %p1548_p4, %p42_p2  ;;  %s2174_s22 = scalar_lea.sflag [#allocation3], %s290_s16 }
  0x8d   : > { %s1796_s23 = scalar_lea.hbm %s2166_s9, 128  ;;  %s1801_s10 = scalar_lea.hbm %s2400_s0, 256 }
  0x8e   : > { %p1797_p12 = scmp.ne.s32.totalorder %s2166_s9, %s1796_s23  ;;  %p1798_p8 = pneg %p2168_p11 }
  0x8f   : > { %p1802_p13 = scmp.lt.u32.totalorder %s2166_s9, %s2400_s0  ;;  %p1803_p0 = scmp.lt.u32.totalorder %s1801_s10, %s1796_s23 }
  0x90   : > { %p1799_p1 = pnand %p1798_p8, %p1797_p12  ;;  %p1805_p5 = scmp.lt.u32.totalorder %s1796_s23, %s2166_s9 }
  0x91   : > { %p1804_p2 = por %p1803_p0, %p1802_p13 }
  0x92   : > { %p1800_p3 = pneg %p1799_p1 }
  0x93   : > { %p1806_p9 = por %p1805_p5, %p1804_p2 }
  0x95   : > { %p1807_p4 = pnand %p1806_p9, %p1800_p3 }
  0x97   : > { %1810 = shalt.err (!%p1807_p4)
}
  0x98   : > { %s1811_s16 = scalar_lea.vmem %s2172_s29, 128  ;;  %s1913_s18 = smov [#allocation2]  }
  0x99   : > { %p1812_p12 = scmp.ne.s32.totalorder %s2172_s29, %s1811_s16  ;;  %s1816_s20 = sshll.u32 %s1913_s18, 4  ;;  %s1817_s20 = int_to_ptr.vmem [resolvable:$false] %s1816_s20 }
  0x9a   : > { %s1818_s21 = scalar_lea.vmem %s1817_s20, 256  ;;  %p1819_p6 = scmp.lt.s32.totalorder %s2172_s29, %s1817_s20 }
  0x9b   : > { %p1814_p1 = pnand %p1812_p12, %p1798_p8  ;;  %p1820_p13 = scmp.lt.s32.totalorder %s1818_s21, %s1811_s16 }
  0x9d   : > { %p1815_p10 = pneg %p1814_p1  ;;  %p1821_p0 = por %p1820_p13, %p1819_p6 }
  0x9f   : > { %p1822_p2 = pnand %p1821_p0, %p1815_p10 }
  0xa1   : > { %1825 = shalt.err (!%p1822_p2)
}
  0xa2   : > { %s2420_s23 = smov 64   ;;  %p2421_p8 = scmp.ne.s32.totalorder %s2412_s8, 0 }
  0xa3   : > { %1538 = dma.hbm_to_vmem [thread:$0]  (!%p2168_p11), %s2166_s9, 128, %s2172_s29, %s2174_s22, %s2420_s23, %s2420_s23, %s1910_s28  }
  0xa4   : > { %313 = sbr.rel (%p2421_p8) target bundleno = 2031 (0x7ef), region = 48  ;;  %s2208_s10 = sand.u32 (!%p2421_p8), 1, %s1896_s25  }
  0xa5   : > { %s1282_s13 = sshll.u32 (!%p2421_p8), %s2208_s10, 3  ;;  %s316_s16 = scalar_lea.sflag (!%p2421_p8), [#allocation3], %s2208_s10 }
  0xa6   : > { %s2212_s18 = scalar_lea.vmem (!%p2421_p8), [#allocation2], %s1282_s13 }
  0xab   : > { %1871 = dma.done.wait (%p2148_p7), %s316_s16, 128  }
  0xac   : > { %1873 = vsyncadd (%p2148_p7), %s316_s16, 4294967168  ;;  %p2422_p6 = scmp.eq.s32.totalorder %s1980_s30, 0 }
  0xae   : > { %1875 = dma.done.wait (%p2422_p6), [#allocation6], 2048   ;;  %p2423_p10 = pmov %p2422_p6 }
  0xaf   : > { %p2424_p11 = pmov %p2422_p6 }
  0xb0   : > { %1877 = vsyncadd (%p2423_p10), [#allocation6], 4294965248 }
  0xb1   : > { %1879 = dma.done.wait (%p2424_p11), [#allocation9], 2048   ;;  %p2425_p3 = pmov %p2422_p6 }
  0xb3   : > { %1881 = vsyncadd (%p2425_p3), [#allocation9], 4294965248  ;;  %p2426_p5 = pmov %p2425_p3 }
  0xb4   : > { %p2427_p9 = pmov %p2425_p3 }
  0xb5   : > { %1883 = dma.done.wait (%p2426_p5), [#allocation12], 1024  }
  0xb6   : > { %1885 = vsyncadd (%p2427_p9), [#allocation12], 4294966272  ;;  %v1914_v0 = vmov 0.0   ;;  %vm1915_vm0 = vmmov 0   ;;  %v1598_v1 = vld [vmem:[#allocation5] sm:$0xff]   ;;  %v1599_v2 = vld [vmem:[#allocation5 + $0x8] sm:$0xff]  }
  0xb7   : > { %1395 = vmatprep.subr.bf16.mxu0 %v1914_v0  ;;  %1411 = vmatprep.mubr.msk.bf16.mxu0 %vm1915_vm0, %v1914_v0  ;;  %v1600_v3 = vld [vmem:[#allocation5 + $0x10] sm:$0xff]   ;;  %v1601_v4 = vld [vmem:[#allocation5 + $0x18] sm:$0xff]   ;;  %v1602_v5 = vld [vmem:[#allocation5 + $0x20] sm:$0xff]   ;;  %s1288_s16 = sshll.u32 %s2208_s10, 4  ;;  %s1349_s9 = sshll.u32 %s1980_s30, 8 }
  0xb8   : > { %1415 = vmatprep.subr.bf16.mxu1 %v1914_v0  ;;  %1431 = vmatprep.mubr.msk.bf16.mxu1 %vm1915_vm0, %v1914_v0  ;;  %v1603_v6 = vld [vmem:[#allocation5 + $0x28] sm:$0xff]   ;;  %v1604_v7 = vld [vmem:[#allocation5 + $0x30] sm:$0xff]   ;;  %v1605_v8 = vld [vmem:[#allocation5 + $0x38] sm:$0xff]   ;;  %s369_s28 = scalar_lea.vmem [#allocation13], %s1288_s16  ;;  %s2356_s22 = scalar_lea.hbm %s2407_s7, %s1349_s9 }
  0xb9   : > { %1396 = vmatpush3.bf16.msra.mxu0 %v1598_v1  ;;  %v2243_v9 = vld [vmem:[%s2212_s18] sm:$0xff]   ;;  %v1607_v19 = vld [vmem:[#allocation7] sm:$0xff]   ;;  %v1608_v20 = vld [vmem:[#allocation7 + $0x8] sm:$0xff]   ;;  %s1149_s15 = sshll.u32 %s369_s28, 4  ;;  %s1136_s20 = scalar_lea.sflag [#allocation4], %s2208_s10  ;;  %s2351_s15 = int_to_ptr.vmem [resolvable:$true] %s1149_s15 }
  0xba   : > { %1397 = vmatprep.subr.bf16.mxu0 %v1914_v0  ;;  %v1289_v10 = vld [vmem:[%s2406_s6] ss:$0 sm:$0xff]  ;;  %1416 = vmatpush3.bf16.msra.mxu1 %v1607_v19  ;;  %v1610_v22 = vld [vmem:[#allocation7 + $0x18] sm:$0xff]   ;;  %v1611_v23 = vld [vmem:[#allocation7 + $0x20] sm:$0xff]   ;;  %v375_v56 = vunpack.c.l.bf16 %v2243_v9  ;;  %v376_v57 = vunpack.c.h.bf16 %v2243_v9  ;;  %s1826_s21 = scalar_lea.vmem %s2351_s15, 256  ;;  %p2428_p4 = scmp.ne.s32.totalorder %s2417_s14, 0 }
  0xbb   : > { %1417 = vmatprep.subr.bf16.mxu1 %v1914_v0  ;;  %v1609_v21 = vld [vmem:[#allocation7 + $0x10] sm:$0xff]   ;;  %v1612_v24 = vld [vmem:[#allocation7 + $0x28] sm:$0xff]   ;;  %v1614_v26 = vld [vmem:[#allocation7 + $0x38] sm:$0xff]   ;;  %p1827_p7 = scmp.ne.s32.totalorder %s2351_s15, %s1826_s21  ;;  %s1916_s30 = smov [#allocation13]  }
  0xbc   : > { %v1613_v25 = vld [vmem:[#allocation7 + $0x30] sm:$0xff]   ;;  %s1830_s23 = sshll.u32 %s1916_s30, 4  ;;  %s1831_s23 = int_to_ptr.vmem [resolvable:$false] %s1830_s23 }
  0xbd   : > { %1398 = vmatpush3.bf16.msra.mxu0 %v1599_v2  ;;  %v1299_v45 = vld [vmem:[%s2406_s6 + $0x1] ss:$0 sm:$0xff]  ;;  %v1300_v47 = vld [vmem:[%s2406_s6 + $0x2] ss:$0 sm:$0xff]  ;;  %v1301_v1 = vld [vmem:[%s2406_s6 + $0x3] ss:$0 sm:$0xff]  ;;  %p1828_p12 = pnand %p1827_p7, %p2428_p4  ;;  %p1833_p13 = scmp.lt.s32.totalorder %s2351_s15, %s1831_s23 }
  0xbe   : > { %1399 = vmatprep.subr.bf16.mxu0 %v1914_v0  ;;  %1418 = vmatpush3.bf16.msra.mxu1 %v1608_v20  ;;  %s1832_s13 = scalar_lea.vmem %s1831_s23, 512 }
  0xbf   : > { %1419 = vmatprep.subr.bf16.mxu1 %v1914_v0  ;;  %p1829_p1 = pneg %p1828_p12  ;;  %p1834_p0 = scmp.lt.s32.totalorder %s1832_s13, %s1826_s21 }
  0xc1   : > { %1400 = vmatpush3.bf16.msra.mxu0 %v1600_v3  ;;  %p1835_p2 = por %p1834_p0, %p1833_p13 }
  0xc2   : > { %1401 = vmatprep.subr.bf16.mxu0 %v1914_v0  ;;  %1420 = vmatpush3.bf16.msra.mxu1 %v1609_v21 }
  0xc3   : > { %1421 = vmatprep.subr.bf16.mxu1 %v1914_v0  ;;  %p1836_p8 = pnand %p1835_p2, %p1829_p1 }
  0xc5   : > { %1402 = vmatpush3.bf16.msra.mxu0 %v1601_v4 }
  0xc6   : > { %1403 = vmatprep.subr.bf16.mxu0 %v1914_v0  ;;  %1422 = vmatpush3.bf16.msra.mxu1 %v1610_v22 }
  0xc7   : > { %1423 = vmatprep.subr.bf16.mxu1 %v1914_v0 }
  0xc9   : > { %1404 = vmatpush3.bf16.msra.mxu0 %v1602_v5 }
  0xca   : > { %1405 = vmatprep.subr.bf16.mxu0 %v1914_v0  ;;  %1424 = vmatpush3.bf16.msra.mxu1 %v1611_v23 }
  0xcb   : > { %1425 = vmatprep.subr.bf16.mxu1 %v1914_v0 }
  0xcd   : > { %1406 = vmatpush3.bf16.msra.mxu0 %v1603_v6 }
  0xce   : > { %1407 = vmatprep.subr.bf16.mxu0 %v1914_v0  ;;  %1426 = vmatpush3.bf16.msra.mxu1 %v1612_v24 }
  0xcf   : > { %1427 = vmatprep.subr.bf16.mxu1 %v1914_v0 }
  0xd1   : > { %1408 = vmatpush3.bf16.msra.mxu0 %v1604_v7 }
  0xd2   : > { %1409 = vmatprep.subr.bf16.mxu0 %v1914_v0  ;;  %1428 = vmatpush3.bf16.msra.mxu1 %v1613_v25 }
  0xd3   : > { %1429 = vmatprep.subr.bf16.mxu1 %v1914_v0 }
  0xd5   : > { %1410 = vmatpush3.bf16.msra.mxu0 %v1605_v8 }
  0xd6   : > { %1435 = vmatprep.subr.bf16.mxu0 %v1914_v0  ;;  %1430 = vmatpush3.bf16.msra.mxu1 %v1614_v26 }
  0xd7   : > { %1455 = vmatprep.subr.bf16.mxu1 %v1914_v0 }
  0xd8   : > { %1412 = vmatmul.mubr.bf16.vlgmr.msra.gmra.mrb[0].mxu0 %v2243_v9 }
  0xd9   : > { %1451 = vmatprep.mubr.msk.bf16.mxu0 %vm1915_vm0, %v1914_v0 }
 0x1ab   : > { %v488_v11 = vpop.f32.mrb[0].mxu0 }
 0x1ac   : > { %v489_v12 = vadd.f32 %v1289_v10, %v488_v11  ;;  %v1413_v13 = vpop.f32.mrb[1].mxu0  ;;  %v1616_v11 = vld [vmem:[#allocation8 + $0x8] sm:$0xff]  }
 0x1ad   : > { %v491_v14 = vpop.f32.mrb[2].mxu0  ;;  %v1618_v13 = vld [vmem:[#allocation8 + $0x18] sm:$0xff]  }
 0x1ae   : > { %v492_v15 = vadd.f32 %v1289_v10, %v491_v14  ;;  %495 = vadd.xlane.f32.xlu0 %v489_v12  ;;  %v1414_v16 = vpop.f32.mrb[3].mxu0  ;;  %v499_v17 = vmul.f32 %v489_v12, %v489_v12  ;;  %v1615_v10 = vld [vmem:[#allocation8] sm:$0xff]  }
 0x1af   : > { %1436 = vmatpush3.bf16.msra.mxu0 %v1615_v10  ;;  %v1619_v14 = vld [vmem:[#allocation8 + $0x20] sm:$0xff]   ;;  %v1621_v16 = vld [vmem:[#allocation8 + $0x30] sm:$0xff]  }
 0x1b0   : > { %501 = vadd.xlane.f32.xlu1 %v499_v17  ;;  %v500_v18 = vmul.f32 %v492_v15, %v492_v15  ;;  %1437 = vmatprep.subr.bf16.mxu0 %v1914_v0  ;;  %v1622_v17 = vld [vmem:[#allocation8 + $0x38] sm:$0xff]  }
 0x1b2   : > { %497 = vadd.xlane.f32.xlu0 %v492_v15 }
 0x1b3   : > { %1438 = vmatpush3.bf16.msra.mxu0 %v1616_v11 }
 0x1b4   : > { %503 = vadd.xlane.f32.xlu1 %v500_v18  ;;  %1439 = vmatprep.subr.bf16.mxu0 %v1914_v0 }
 0x23b   : > { %v496_v27 = vpop.xlane.xlu0 %495 }
 0x23c   : > { %v505_v28 = vmul.f32 0.03125, %v496_v27 }
 0x23d   : > { %v502_v29 = vpop.xlane.xlu1 %501 }
 0x23e   : > { %v509_v30 = vmul.f32 %v505_v28, %v505_v28  ;;  %v507_v31 = vmul.f32 0.03125, %v502_v29  ;;  %v515_v43 = vsub.f32 %v489_v12, %v505_v28  ;;  %v1617_v12 = vld [vmem:[#allocation8 + $0x10] sm:$0xff]  }
 0x23f   : > { %v498_v32 = vpop.xlane.xlu0 %497  ;;  %1440 = vmatpush3.bf16.msra.mxu0 %v1617_v12 }
 0x240   : > { %v511_v33 = vsub.f32 %v507_v31, %v509_v30  ;;  %v506_v34 = vmul.f32 0.03125, %v498_v32  ;;  %1441 = vmatprep.subr.bf16.mxu0 %v1914_v0 }
 0x241   : > { %v504_v35 = vpop.xlane.xlu1 %503 }
 0x242   : > { %v513_v36 = vmax.f32 %v511_v33, 0.0  ;;  %v510_v37 = vmul.f32 %v506_v34, %v506_v34  ;;  %v508_v38 = vmul.f32 0.03125, %v504_v35  ;;  %v516_v48 = vsub.f32 %v492_v15, %v506_v34  ;;  %v1620_v15 = vld [vmem:[#allocation8 + $0x28] sm:$0xff]  }
 0x243   : > { %1442 = vmatpush3.bf16.msra.mxu0 %v1618_v13 }
 0x244   : > { %v517_v39 = vadd.f32 1e-05, %v513_v36  ;;  %v512_v40 = vsub.f32 %v508_v38, %v510_v37  ;;  %1443 = vmatprep.subr.bf16.mxu0 %v1914_v0  ;;  %v1310_v36 = vld [vmem:[%s2406_s6 + $0x4] ss:$0 sm:$0xff] }
 0x246   : > { %1640 = vrsqrt.f32 %v517_v39  ;;  %v514_v41 = vmax.f32 %v512_v40, 0.0  ;;  %v1311_v40 = vld [vmem:[%s2406_s6 + $0x5] ss:$0 sm:$0xff] }
 0x247   : > { %1444 = vmatpush3.bf16.msra.mxu0 %v1619_v14 }
 0x248   : > { %v518_v42 = vadd.f32 1e-05, %v514_v41  ;;  %1445 = vmatprep.subr.bf16.mxu0 %v1914_v0 }
 0x24a   : > { %1642 = vrsqrt.f32 %v518_v42 }
 0x24b   : > { %1446 = vmatpush3.bf16.msra.mxu0 %v1620_v15 }
 0x24c   : > { %1447 = vmatprep.subr.bf16.mxu0 %v1914_v0 }
 0x24f   : > { %1448 = vmatpush3.bf16.msra.mxu0 %v1621_v16 }
 0x250   : > { %v1641_v44 = vpop.eup %1640  ;;  %1449 = vmatprep.subr.bf16.mxu0 %v1914_v0 }
 0x251   : > { %v521_v46 = vmul.f32 %v1641_v44, %v515_v43 }
 0x253   : > { %v527_v49 = vmul.f32 %v1299_v45, %v521_v46  ;;  %1450 = vmatpush3.bf16.msra.mxu0 %v1622_v17 }
 0x254   : > { %v1643_v50 = vpop.eup %1642  ;;  %1475 = vmatprep.subr.bf16.mxu0 %v1914_v0 }
 0x255   : > { %v522_v51 = vmul.f32 %v1643_v50, %v516_v48  ;;  %v533_v52 = vadd.f32 %v1300_v47, %v527_v49 }
 0x257   : > { %v528_v53 = vmul.f32 %v1299_v45, %v522_v51  ;;  %v535_v54 = vmul.f32 0.2, %v533_v52 }
 0x259   : > { %v534_v55 = vadd.f32 %v1300_v47, %v528_v53  ;;  %v537_v59 = vmax.f32 %v533_v52, %v535_v54  ;;  %v1312_v53 = vld [vmem:[%s2406_s6 + $0x6] ss:$0 sm:$0xff] }
 0x25b   : > { %v536_v58 = vmul.f32 0.2, %v534_v55  ;;  %v2269_v61 = vadd.f32 %v537_v59, %v375_v56 }
 0x25d   : > { %v538_v60 = vmax.f32 %v534_v55, %v536_v58 }
 0x25f   : > { %v2271_v62 = vadd.f32 %v538_v60, %v376_v57 }
 0x261   : > { %v544_v63 = vpack.c.bf16 %v2271_v62, %v2269_v61 }
 0x263   : > { %1432 = vmatmul.mubr.bf16.vlgmr.msra.gmra.mrb[0].mxu1 %v544_v63  ;;  %v1624_v63 = vld [vmem:[#allocation10 + $0x8] sm:$0xff]  }
 0x264   : > { %1471 = vmatprep.mubr.msk.bf16.mxu1 %vm1915_vm0, %v1914_v0 }
 0x336   : > { %v647_v2 = vpop.f32.mrb[0].mxu1 }
 0x337   : > { %v648_v3 = vadd.f32 %v1301_v1, %v647_v2  ;;  %v1433_v4 = vpop.f32.mrb[1].mxu1  ;;  %v1626_v2 = vld [vmem:[#allocation10 + $0x18] sm:$0xff]  }
 0x338   : > { %v650_v5 = vpop.f32.mrb[2].mxu1  ;;  %v1628_v4 = vld [vmem:[#allocation10 + $0x28] sm:$0xff]  }
 0x339   : > { %v651_v6 = vadd.f32 %v1301_v1, %v650_v5  ;;  %654 = vadd.xlane.f32.xlu0 %v648_v3  ;;  %v1434_v7 = vpop.f32.mrb[3].mxu1  ;;  %v658_v8 = vmul.f32 %v648_v3, %v648_v3  ;;  %v1625_v1 = vld [vmem:[#allocation10 + $0x10] sm:$0xff]  }
 0x33a   : > { %v1629_v5 = vld [vmem:[#allocation10 + $0x30] sm:$0xff]  }
 0x33b   : > { %656 = vadd.xlane.f32.xlu1 %v651_v6  ;;  %v659_v9 = vmul.f32 %v651_v6, %v651_v6 }
 0x33d   : > { %660 = vadd.xlane.f32.xlu0 %v658_v8 }
 0x33f   : > { %662 = vadd.xlane.f32.xlu1 %v659_v9 }
 0x3c6   : > { %v655_v18 = vpop.xlane.xlu0 %654 }
 0x3c7   : > { %v664_v19 = vmul.f32 0.03125, %v655_v18 }
 0x3c8   : > { %v657_v20 = vpop.xlane.xlu1 %656 }
 0x3c9   : > { %v665_v21 = vmul.f32 0.03125, %v657_v20  ;;  %v668_v23 = vmul.f32 %v664_v19, %v664_v19  ;;  %v674_v34 = vsub.f32 %v648_v3, %v664_v19  ;;  %v1627_v3 = vld [vmem:[#allocation10 + $0x20] sm:$0xff]  }
 0x3ca   : > { %v661_v22 = vpop.xlane.xlu0 %660 }
 0x3cb   : > { %v666_v24 = vmul.f32 0.03125, %v661_v22  ;;  %v669_v26 = vmul.f32 %v665_v21, %v665_v21  ;;  %v675_v37 = vsub.f32 %v651_v6, %v665_v21  ;;  %v1630_v6 = vld [vmem:[#allocation10 + $0x38] sm:$0xff]  }
 0x3cc   : > { %v663_v25 = vpop.xlane.xlu1 %662 }
 0x3cd   : > { %v670_v27 = vsub.f32 %v666_v24, %v668_v23  ;;  %v667_v28 = vmul.f32 0.03125, %v663_v25  ;;  %v1321_v25 = vld [vmem:[%s2406_s6 + $0x7] ss:$0 sm:$0xff] }
 0x3cf   : > { %v672_v29 = vmax.f32 %v670_v27, 0.0  ;;  %v671_v30 = vsub.f32 %v667_v28, %v669_v26 }
 0x3d1   : > { %v676_v31 = vadd.f32 1e-05, %v672_v29  ;;  %v673_v32 = vmax.f32 %v671_v30, 0.0  ;;  %v1322_v29 = vld [vmem:[%s2406_s6 + $0x8] ss:$0 sm:$0xff] }
 0x3d3   : > { %1644 = vrsqrt.f32 %v676_v31  ;;  %v677_v33 = vadd.f32 1e-05, %v673_v32 }
 0x3d5   : > { %1646 = vrsqrt.f32 %v677_v33 }
 0x3dd   : > { %v1645_v35 = vpop.eup %1644 }
 0x3de   : > { %v680_v38 = vmul.f32 %v1645_v35, %v674_v34 }
 0x3df   : > { %v1647_v39 = vpop.eup %1646 }
 0x3e0   : > { %v681_v41 = vmul.f32 %v1647_v39, %v675_v37  ;;  %v686_v42 = vmul.f32 %v1310_v36, %v680_v38 }
 0x3e2   : > { %v687_v43 = vmul.f32 %v1310_v36, %v681_v41  ;;  %v692_v44 = vadd.f32 %v1311_v40, %v686_v42  ;;  %v1323_v42 = vld [vmem:[%s2406_s6 + $0x9] ss:$0 sm:$0xff] }
 0x3e4   : > { %v693_v45 = vadd.f32 %v1311_v40, %v687_v43  ;;  %v694_v46 = vmul.f32 0.2, %v692_v44 }
 0x3e6   : > { %v695_v47 = vmul.f32 0.2, %v693_v45  ;;  %v696_v48 = vmax.f32 %v692_v44, %v694_v46 }
 0x3e8   : > { %v697_v49 = vmax.f32 %v693_v45, %v695_v47  ;;  %v2295_v50 = vadd.f32 %v696_v48, %v2269_v61 }
 0x3ea   : > { %v2298_v51 = vadd.f32 %v697_v49, %v2271_v62  ;;  %v1623_v62 = vld [vmem:[#allocation10] sm:$0xff]  }
 0x3eb   : > { %1456 = vmatpush3.bf16.msra.mxu1 %v1623_v62 }
 0x3ec   : > { %v703_v52 = vpack.c.bf16 %v2298_v51, %v2295_v50  ;;  %1457 = vmatprep.subr.bf16.mxu1 %v1914_v0 }
 0x3ee   : > { %1452 = vmatmul.mubr.bf16.vlgmr.msra.gmra.mrb[4].mxu0 %v703_v52  ;;  %v1632_v52 = vld [vmem:[#allocation11 + $0x8] sm:$0xff]  }
 0x3ef   : > { %1491 = vmatprep.mubr.msk.bf16.mxu0 %vm1915_vm0, %v1914_v0  ;;  %1458 = vmatpush3.bf16.msra.mxu1 %v1624_v63 }
 0x3f0   : > { %1459 = vmatprep.subr.bf16.mxu1 %v1914_v0 }
 0x3f3   : > { %1460 = vmatpush3.bf16.msra.mxu1 %v1625_v1 }
 0x3f4   : > { %1461 = vmatprep.subr.bf16.mxu1 %v1914_v0 }
 0x3f7   : > { %1462 = vmatpush3.bf16.msra.mxu1 %v1626_v2 }
 0x3f8   : > { %1463 = vmatprep.subr.bf16.mxu1 %v1914_v0 }
 0x3fb   : > { %1464 = vmatpush3.bf16.msra.mxu1 %v1627_v3 }
 0x3fc   : > { %1465 = vmatprep.subr.bf16.mxu1 %v1914_v0 }
 0x3ff   : > { %1466 = vmatpush3.bf16.msra.mxu1 %v1628_v4 }
 0x400   : > { %1467 = vmatprep.subr.bf16.mxu1 %v1914_v0 }
 0x403   : > { %1468 = vmatpush3.bf16.msra.mxu1 %v1629_v5 }
 0x404   : > { %1469 = vmatprep.subr.bf16.mxu1 %v1914_v0 }
 0x407   : > { %1470 = vmatpush3.bf16.msra.mxu1 %v1630_v6 }
 0x4c1   : > { %v806_v54 = vpop.f32.mrb[4].mxu0 }
 0x4c2   : > { %v807_v55 = vadd.f32 %v1312_v53, %v806_v54  ;;  %v1453_v56 = vpop.f32.mrb[5].mxu0  ;;  %v1634_v54 = vld [vmem:[#allocation11 + $0x18] sm:$0xff]  }
 0x4c3   : > { %v809_v57 = vpop.f32.mrb[6].mxu0  ;;  %v1636_v56 = vld [vmem:[#allocation11 + $0x28] sm:$0xff]  }
 0x4c4   : > { %v810_v58 = vadd.f32 %v1312_v53, %v809_v57  ;;  %813 = vadd.xlane.f32.xlu0 %v807_v55  ;;  %v1454_v59 = vpop.f32.mrb[7].mxu0  ;;  %v817_v60 = vmul.f32 %v807_v55, %v807_v55  ;;  %v1633_v53 = vld [vmem:[#allocation11 + $0x10] sm:$0xff]  }
 0x4c5   : > { %v1637_v57 = vld [vmem:[#allocation11 + $0x30] sm:$0xff]  }
 0x4c6   : > { %815 = vadd.xlane.f32.xlu1 %v810_v58  ;;  %v818_v61 = vmul.f32 %v810_v58, %v810_v58 }
 0x4c8   : > { %819 = vadd.xlane.f32.xlu0 %v817_v60 }
 0x4ca   : > { %821 = vadd.xlane.f32.xlu1 %v818_v61 }
 0x551   : > { %v814_v7 = vpop.xlane.xlu0 %813 }
 0x552   : > { %v823_v8 = vmul.f32 0.03125, %v814_v7 }
 0x553   : > { %v816_v9 = vpop.xlane.xlu1 %815 }
 0x554   : > { %v824_v10 = vmul.f32 0.03125, %v816_v9  ;;  %v827_v12 = vmul.f32 %v823_v8, %v823_v8  ;;  %v833_v23 = vsub.f32 %v807_v55, %v823_v8  ;;  %v1635_v55 = vld [vmem:[#allocation11 + $0x20] sm:$0xff]  }
 0x555   : > { %v820_v11 = vpop.xlane.xlu0 %819 }
 0x556   : > { %v825_v13 = vmul.f32 0.03125, %v820_v11  ;;  %v828_v15 = vmul.f32 %v824_v10, %v824_v10  ;;  %v834_v26 = vsub.f32 %v810_v58, %v824_v10  ;;  %v1638_v58 = vld [vmem:[#allocation11 + $0x38] sm:$0xff]  }
 0x557   : > { %v822_v14 = vpop.xlane.xlu1 %821 }
 0x558   : > { %v829_v16 = vsub.f32 %v825_v13, %v827_v12  ;;  %v826_v17 = vmul.f32 0.03125, %v822_v14  ;;  %v1332_v13 = vld [vmem:[%s2406_s6 + $0xa] ss:$0 sm:$0xff] }
 0x55a   : > { %v831_v18 = vmax.f32 %v829_v16, 0.0  ;;  %v830_v19 = vsub.f32 %v826_v17, %v828_v15  ;;  %v1333_v17 = vld [vmem:[%s2406_s6 + $0xb] ss:$0 sm:$0xff] }
 0x55c   : > { %v835_v20 = vadd.f32 1e-05, %v831_v18  ;;  %v832_v21 = vmax.f32 %v830_v19, 0.0 }
 0x55e   : > { %1648 = vrsqrt.f32 %v835_v20  ;;  %v836_v22 = vadd.f32 1e-05, %v832_v21 }
 0x560   : > { %1650 = vrsqrt.f32 %v836_v22 }
 0x568   : > { %v1649_v24 = vpop.eup %1648 }
 0x569   : > { %v839_v27 = vmul.f32 %v1649_v24, %v833_v23 }
 0x56a   : > { %v1651_v28 = vpop.eup %1650 }
 0x56b   : > { %v840_v30 = vmul.f32 %v1651_v28, %v834_v26  ;;  %v845_v31 = vmul.f32 %v1321_v25, %v839_v27 }
 0x56d   : > { %v846_v32 = vmul.f32 %v1321_v25, %v840_v30  ;;  %v851_v33 = vadd.f32 %v1322_v29, %v845_v31  ;;  %v1334_v30 = vld [vmem:[%s2406_s6 + $0xc] ss:$0 sm:$0xff] }
 0x56f   : > { %v852_v34 = vadd.f32 %v1322_v29, %v846_v32  ;;  %v853_v35 = vmul.f32 0.2, %v851_v33 }
 0x571   : > { %v854_v36 = vmul.f32 0.2, %v852_v34  ;;  %v855_v37 = vmax.f32 %v851_v33, %v853_v35 }
 0x573   : > { %v856_v38 = vmax.f32 %v852_v34, %v854_v36  ;;  %v2321_v39 = vadd.f32 %v855_v37, %v2295_v50 }
 0x575   : > { %v2324_v40 = vadd.f32 %v856_v38, %v2298_v51  ;;  %v1631_v51 = vld [vmem:[#allocation11] sm:$0xff]  }
 0x576   : > { %1476 = vmatpush3.bf16.msra.mxu0 %v1631_v51 }
 0x577   : > { %v862_v41 = vpack.c.bf16 %v2324_v40, %v2321_v39  ;;  %1477 = vmatprep.subr.bf16.mxu0 %v1914_v0 }
 0x579   : > { %1472 = vmatmul.mubr.bf16.vlgmr.msra.gmra.mrb[4].mxu1 %v862_v41 }
 0x57a   : > { %1478 = vmatpush3.bf16.msra.mxu0 %v1632_v52 }
 0x57b   : > { %1479 = vmatprep.subr.bf16.mxu0 %v1914_v0 }
 0x57e   : > { %1480 = vmatpush3.bf16.msra.mxu0 %v1633_v53 }
 0x57f   : > { %1481 = vmatprep.subr.bf16.mxu0 %v1914_v0 }
 0x582   : > { %1482 = vmatpush3.bf16.msra.mxu0 %v1634_v54 }
 0x583   : > { %1483 = vmatprep.subr.bf16.mxu0 %v1914_v0 }
 0x586   : > { %1484 = vmatpush3.bf16.msra.mxu0 %v1635_v55 }
 0x587   : > { %1485 = vmatprep.subr.bf16.mxu0 %v1914_v0 }
 0x58a   : > { %1486 = vmatpush3.bf16.msra.mxu0 %v1636_v56 }
 0x58b   : > { %1487 = vmatprep.subr.bf16.mxu0 %v1914_v0 }
 0x58e   : > { %1488 = vmatpush3.bf16.msra.mxu0 %v1637_v57 }
 0x58f   : > { %1489 = vmatprep.subr.bf16.mxu0 %v1914_v0 }
 0x592   : > { %1490 = vmatpush3.bf16.msra.mxu0 %v1638_v58 }
 0x64c   : > { %v965_v43 = vpop.f32.mrb[4].mxu1 }
 0x64d   : > { %v966_v44 = vadd.f32 %v1323_v42, %v965_v43  ;;  %v1473_v45 = vpop.f32.mrb[5].mxu1 }
 0x64e   : > { %v968_v46 = vpop.f32.mrb[6].mxu1 }
 0x64f   : > { %v969_v47 = vadd.f32 %v1323_v42, %v968_v46  ;;  %972 = vadd.xlane.f32.xlu0 %v966_v44  ;;  %v1474_v48 = vpop.f32.mrb[7].mxu1  ;;  %v976_v49 = vmul.f32 %v966_v44, %v966_v44 }
 0x651   : > { %974 = vadd.xlane.f32.xlu1 %v969_v47  ;;  %v977_v50 = vmul.f32 %v969_v47, %v969_v47 }
 0x653   : > { %978 = vadd.xlane.f32.xlu0 %v976_v49 }
 0x655   : > { %980 = vadd.xlane.f32.xlu1 %v977_v50 }
 0x6dc   : > { %v973_v59 = vpop.xlane.xlu0 %972 }
 0x6dd   : > { %v982_v60 = vmul.f32 0.03125, %v973_v59 }
 0x6de   : > { %v975_v61 = vpop.xlane.xlu1 %974 }
 0x6df   : > { %v983_v62 = vmul.f32 0.03125, %v975_v61  ;;  %v986_v1 = vmul.f32 %v982_v60, %v982_v60  ;;  %v992_v0 = vsub.f32 %v966_v44, %v982_v60 }
 0x6e0   : > { %v979_v63 = vpop.xlane.xlu0 %978 }
 0x6e1   : > { %v984_v2 = vmul.f32 0.03125, %v979_v63  ;;  %v987_v4 = vmul.f32 %v983_v62, %v983_v62  ;;  %v993_v14 = vsub.f32 %v969_v47, %v983_v62 }
 0x6e2   : > { %v981_v3 = vpop.xlane.xlu1 %980 }
 0x6e3   : > { %v988_v5 = vsub.f32 %v984_v2, %v986_v1  ;;  %v985_v6 = vmul.f32 0.03125, %v981_v3 }
 0x6e5   : > { %v990_v7 = vmax.f32 %v988_v5, 0.0  ;;  %v989_v8 = vsub.f32 %v985_v6, %v987_v4 }
 0x6e7   : > { %v994_v9 = vadd.f32 1e-05, %v990_v7  ;;  %v991_v10 = vmax.f32 %v989_v8, 0.0 }
 0x6e9   : > { %1652 = vrsqrt.f32 %v994_v9  ;;  %v995_v11 = vadd.f32 1e-05, %v991_v10 }
 0x6eb   : > { %1654 = vrsqrt.f32 %v995_v11 }
 0x6f3   : > { %v1653_v12 = vpop.eup %1652 }
 0x6f4   : > { %v998_v15 = vmul.f32 %v1653_v12, %v992_v0 }
 0x6f5   : > { %v1655_v16 = vpop.eup %1654 }
 0x6f6   : > { %v999_v18 = vmul.f32 %v1655_v16, %v993_v14  ;;  %v1004_v19 = vmul.f32 %v1332_v13, %v998_v15 }
 0x6f8   : > { %v1005_v20 = vmul.f32 %v1332_v13, %v999_v18  ;;  %v1010_v21 = vadd.f32 %v1333_v17, %v1004_v19 }
 0x6fa   : > { %v1011_v22 = vadd.f32 %v1333_v17, %v1005_v20  ;;  %v1012_v23 = vmul.f32 0.2, %v1010_v21 }
 0x6fc   : > { %v1013_v24 = vmul.f32 0.2, %v1011_v22  ;;  %v1014_v25 = vmax.f32 %v1010_v21, %v1012_v23 }
 0x6fe   : > { %v1015_v26 = vmax.f32 %v1011_v22, %v1013_v24  ;;  %v1016_v27 = vadd.f32 %v1014_v25, %v2321_v39 }
 0x700   : > { %v1017_v28 = vadd.f32 %v1015_v26, %v2324_v40 }
 0x702   : > { %v1018_v29 = vpack.c.bf16 %v1017_v28, %v1016_v27 }
 0x704   : > { %1492 = vmatmul.mubr.bf16.vlgmr.msra.gmra.mrb[8].mxu0 %v1018_v29 }
 0x7d7   : > { %v1122_v31 = vpop.f32.mrb[8].mxu0 }
 0x7d8   : > { %v1123_v32 = vadd.f32 %v1334_v30, %v1122_v31  ;;  %v1493_v33 = vpop.f32.mrb[9].mxu0 }
 0x7d9   : > { %v1125_v34 = vpop.f32.mrb[10].mxu0 }
 0x7da   : > { %v1129_v35 = vmul.f32 0.2, %v1123_v32  ;;  %v1126_v36 = vadd.f32 %v1334_v30, %v1125_v34  ;;  %v1494_v37 = vpop.f32.mrb[11].mxu0 }
 0x7dc   : > { %v1131_v38 = vmax.f32 %v1123_v32, %v1129_v35  ;;  %v1130_v39 = vmul.f32 0.2, %v1126_v36 }
 0x7de   : > { %1133 = vst [vmem:[%s369_s28] sm:$0xff] %v1131_v38  ;;  %v1132_v40 = vmax.f32 %v1126_v36, %v1130_v39 }
 0x7e0   : > { %1134 = vst [vmem:[%s369_s28 + $0x8] sm:$0xff] %v1132_v40 }
 0x7e1   : > { %1839 = shalt.err (!%p1836_p8)
}
 0x7e2   : > { %s1840_s16 = scalar_lea.hbm %s2356_s22, 256  ;;  %s1844_s28 = scalar_lea.hbm %s2407_s7, 512 }
 0x7e3   : > { %p1841_p6 = scmp.ne.s32.totalorder %s2356_s22, %s1840_s16  ;;  %p1845_p3 = scmp.lt.u32.totalorder %s2356_s22, %s2407_s7 }
 0x7e4   : > { %p1846_p5 = scmp.lt.u32.totalorder %s1844_s28, %s1840_s16  ;;  %p1848_p7 = scmp.lt.u32.totalorder %s1840_s16, %s2356_s22 }
 0x7e5   : > { %p1842_p10 = pnand %p1841_p6, %p2428_p4 }
 0x7e6   : > { %p1847_p9 = por %p1846_p5, %p1845_p3 }
 0x7e7   : > { %p1843_p11 = pneg %p1842_p10 }
 0x7e8   : > { %p1849_p12 = por %p1848_p7, %p1847_p9 }
 0x7ea   : > { %p1850_p1 = pnand %p1849_p12, %p1843_p11 }
 0x7ec   : > { %1853 = shalt.err (!%p1850_p1)
}
 0x7ed   : > { %s1917_s11 = smov 128   ;;  %s1918_s21 = smov 8  }
 0x7ee   : > { %1517 = dma.vmem_to_hbm [thread:$0]  (%p2428_p4), %s2351_s15, 256, %s2356_s22, %s1136_s20, %s1917_s11, %s1917_s11, %s1918_s21  }
 0x7ef PF: > { %s1164_s30 = sand.u32 1, %s1892_s24   ;;  %p2429_p13 = scmp.ne.s32.totalorder %s2418_s17, 0 }
 0x7f0   : > { %p2430_p0 = scmp.ge.s32.totalorder %s1904_s27, 2  ;;  %s1165_s23 = scalar_lea.sflag [#allocation4], %s1164_s30 }
 0x7f2   : > { %p1540_p2 = pnand %p2430_p0, %p2429_p13 }
 0x7f4   : > { %1887 = dma.done.wait (!%p1540_p2), %s1165_s23, 256  }
 0x7f5   : > { %1889 = vsyncadd (!%p1540_p2), %s1165_s23, 4294967040  ;;  %p23_p8 = scmp.ge.s32.totalorder %s2132_s19, 4   ;;  %s2431_s24 = smov %s1896_s25 }
 0x7f6   : > { %s2432_s25 = smov %s1900_s26  ;;  %s2433_s26 = smov %s2144_s12 }
 0x7f7   : > { %s2434_s27 = smov %s2132_s19  ;;  %25 = sbr.rel (!%p23_p8) target bundleno = 8 (0x8), region = 113 }
 0x7fe   :  { %1170 = vsyncpa [#allocation3], 1 }
 0x7ff   :  { %1172 = vsyncpa [#allocation3 + $0x1], 1 }
 0x800   :  { %1173 = vsyncpa [#allocation6], 1 }
 0x801   :  { %1174 = vsyncpa [#allocation9], 1 }
 0x802   :  { %1175 = vsyncpa [#allocation12], 1 }
 0x803   :  { %1176 = vsyncpa [#allocation4], 1 }
 0x804   :  { %1178 = vsyncpa [#allocation4 + $0x1], 1 }

</bundles_post_ra>
